<compile_context>
chip_gen: v7x
topology: tpu7x:2x2x1
jax: 0.10.0
libtpu: 0.0.40
codegen_flags: <defaults>
</compile_context>

<pallas_src>
import functools
import math

import jax
import jax.numpy as jnp
from jax import lax
from jax.experimental import pallas as pl
from jax.experimental.pallas import tpu as pltpu

F32 = jnp.float32

# lane indices of the packed (1, 128) per-core loss vector
(_FOCAL_BULK, _FOCAL_CORR, _CARD, _L1, _GIOU,
 _TEXT_SUM, _CHAR_SUM, _CHAR_CNT, _CLIP) = range(9)


def _cdiv(a, b):
    return -(-a // b)


def _round_up(a, b):
    return _cdiv(a, b) * b


def _pad_rows(a, rows):
    if a.shape[0] == rows:
        return a
    pad = jnp.zeros((rows - a.shape[0],) + a.shape[1:], a.dtype)
    return jnp.concatenate([a, pad], axis=0)


# --------------------------------------------------------------------------
# In-kernel helpers
# --------------------------------------------------------------------------

def _masked_ce_sum(logits, tgt_col, valid_col):
    """Row-wise softmax cross entropy, masked.  logits:[N,V] f32, tgt:[N,1] i32."""
    m = jnp.max(logits, axis=1, keepdims=True)
    lse = m + jnp.log(jnp.sum(jnp.exp(logits - m), axis=1, keepdims=True))
    col = lax.broadcasted_iota(jnp.int32, logits.shape, 1)
    picked = jnp.sum(jnp.where(col == tgt_col, logits, 0.0), axis=1, keepdims=True)
    return jnp.sum((lse - picked) * valid_col)


def _sigmoid_and_softplus(x):
    """One exp(-|x|) shared by sigmoid(x) and softplus(x)."""
    e = jnp.exp(-jnp.abs(x))
    softplus = jnp.maximum(x, 0.0) + jnp.log(1.0 + e)
    inv1pe = pl.reciprocal(1.0 + e, approx=True)           # EUP slot; ~1e-3 rel err
    prob = jnp.where(x >= 0.0, inv1pe, e * inv1pe)
    return prob, softplus


def _pow_gamma(v, gamma):
    if float(gamma) == 2.0:
        return v * v
    return jnp.exp(gamma * jnp.log(jnp.maximum(v, 1e-38)))


# --------------------------------------------------------------------------
# Fused loss kernel
# --------------------------------------------------------------------------

def _fused_loss_kernel(flat_ref, corr_ref, box_ref,
                       txt_ref, txt_tgt_ref, chr_ref, chr_tgt_ref,
                       mqc_ref, lens_ref, img_ref, tfeat_ref, scale_ref,
                       out_ref, acc_ref,
                       *, alpha, gamma, nsteps,
                       n_txt_valid, n_chr_valid, n_box_valid):
    core = pl.program_id(0)
    j = pl.program_id(1)
    last = nsteps - 1

    @pl.when(j == 0)
    def _init():
        acc_ref[...] = jnp.zeros_like(acc_ref)

    # ---------- dominant path: lane-dense focal bulk (one-hot == 0) ----------
    x = flat_ref[...].astype(F32)                            # (rows_blk, 128)
    prob, sp = _sigmoid_and_softplus(x)
    loss0 = _pow_gamma(prob, gamma) * sp                     # focal with t = 0
    if alpha >= 0:
        loss0 = (1.0 - alpha) * loss0
    acc_ref[...] += jnp.sum(loss0, axis=0, keepdims=True)    # per-lane partials

    # ---------- one-shot work, once per core at the final grid step ----------
    @pl.when(j == last)
    def _tail_common():
        lane = lax.broadcasted_iota(jnp.int32, (1, 128), 1)

        # text CE partial sum over this core's row slice of [M*T, V]
        rows_txt = txt_ref.shape[0]
        tl = txt_ref[...].astype(F32)
        row = core * rows_txt + lax.broadcasted_iota(jnp.int32, (rows_txt, 1), 0)
        tvalid = (row < n_txt_valid).astype(F32)
        txt_sum = _masked_ce_sum(tl, txt_tgt_ref[...], tvalid)

        # char CE partial sum over this core's row slice of [B*L, Vc] (pad id 0)
        rows_chr = chr_ref.shape[0]
        cl = chr_ref[...].astype(F32)
        ct = chr_tgt_ref[...]
        crow = core * rows_chr + lax.broadcasted_iota(jnp.int32, (rows_chr, 1), 0)
        cvalid = jnp.logical_and(crow < n_chr_valid, ct != 0).astype(F32)
        chr_sum = _masked_ce_sum(cl, ct, cvalid)
        chr_cnt = jnp.sum(cvalid)

        # single full overwrite of the packed (1, 128) output per core
        out_ref[...] = (jnp.where(lane == _FOCAL_BULK, jnp.sum(acc_ref[...]), 0.0)
                        + jnp.where(lane == _TEXT_SUM, txt_sum, 0.0)
                        + jnp.where(lane == _CHAR_SUM, chr_sum, 0.0)
                        + jnp.where(lane == _CHAR_CNT, chr_cnt, 0.0))

    @pl.when(jnp.logical_and(j == last, core == 0))
    def _tail_core0():
        lane = lax.broadcasted_iota(jnp.int32, (1, 128), 1)
        eps = 1e-7

        # boxes: lane-major [8, Mb] (src cxcywh rows 0..3, tgt rows 4..7)
        b = box_ref[...].astype(F32)
        col = lax.broadcasted_iota(jnp.int32, (1, b.shape[1]), 1)
        bvalid = (col < n_box_valid).astype(F32)
        l1 = jnp.sum(jnp.abs(b[0:4] - b[4:8]) * bvalid)

        scx, scy, sw, sh = b[0:1], b[1:2], b[2:3], b[3:4]
        gcx, gcy, gw, gh = b[4:5], b[5:6], b[6:7], b[7:8]
        sx0, sy0, sx1, sy1 = scx - 0.5 * sw, scy - 0.5 * sh, scx + 0.5 * sw, scy + 0.5 * sh
        gx0, gy0, gx1, gy1 = gcx - 0.5 * gw, gcy - 0.5 * gh, gcx + 0.5 * gw, gcy + 0.5 * gh
        area_s = (sx1 - sx0) * (sy1 - sy0)
        area_g = (gx1 - gx0) * (gy1 - gy0)
        iw = jnp.maximum(jnp.minimum(sx1, gx1) - jnp.maximum(sx0, gx0), 0.0)
        ih = jnp.maximum(jnp.minimum(sy1, gy1) - jnp.maximum(sy0, gy0), 0.0)
        inter = iw * ih
        union = area_s + area_g - inter
        iou = inter / (union + eps)
        ew = jnp.maximum(sx1, gx1) - jnp.minimum(sx0, gx0)
        eh = jnp.maximum(sy1, gy1) - jnp.minimum(sy0, gy0)
        encl = ew * eh
        giou = iou - (encl - union) / (encl + eps)
        giou_sum = jnp.sum((1.0 - giou) * bvalid)

        # CLIP: one MXU matmul; image- and text-side CE from a single exp pass
        img = img_ref[...].astype(F32)                         # (Bc, D)
        tf = jnp.mean(tfeat_ref[...].astype(F32), axis=0)      # (Bc, D) (r/s/e avg)
        lg = scale_ref[0] * lax.dot_general(
            img, tf, (((1,), (1,)), ((), ())), preferred_element_type=F32)
        gmax = jnp.max(lg)
        eL = jnp.exp(lg - gmax)
        r = lax.broadcasted_iota(jnp.int32, lg.shape, 0)
        c = lax.broadcasted_iota(jnp.int32, lg.shape, 1)
        diag_r = jnp.sum(jnp.where(r == c, lg, 0.0), axis=1, keepdims=True)
        diag_c = jnp.sum(jnp.where(r == c, lg, 0.0), axis=0, keepdims=True)
        lse_r = gmax + jnp.log(jnp.maximum(jnp.sum(eL, axis=1, keepdims=True), 1e-30))
        lse_c = gmax + jnp.log(jnp.maximum(jnp.sum(eL, axis=0, keepdims=True), 1e-30))
        clip = 0.5 * (jnp.mean(lse_r - diag_r) + jnp.mean(lse_c - diag_c))

        out_ref[...] += (jnp.where(lane == _L1, l1, 0.0)
                         + jnp.where(lane == _GIOU, giou_sum, 0.0)
                         + jnp.where(lane == _CLIP, clip, 0.0))

    @pl.when(jnp.logical_and(j == last, core == pl.num_programs(0) - 1))
    def _tail_core_last():
        lane = lax.broadcasted_iota(jnp.int32, (1, 128), 1)

        # focal correction on the matched (query, ctrl-point, label) logits
        xm = corr_ref[...].astype(F32)                         # (1, M*P)
        pm, spm = _sigmoid_and_softplus(xm)
        loss1 = _pow_gamma(1.0 - pm, gamma) * (spm - xm)       # focal with t = 1
        loss0m = _pow_gamma(pm, gamma) * spm                   # focal with t = 0
        if alpha >= 0:
            loss1 = alpha * loss1
            loss0m = (1.0 - alpha) * loss0m
        corr = jnp.sum(loss1 - loss0m)

        # cardinality error (ctrl-point mean precomputed host-side; logging only)
        m = mqc_ref[...].astype(F32)                           # (B, Q, C)
        is_fg = (m[:, :, 0:1] >= jnp.max(m, axis=2, keepdims=True)).astype(F32)
        card = jnp.sum(is_fg, axis=1)                          # (B, 1)
        card_sum = jnp.sum(jnp.abs(card - lens_ref[...].astype(F32)))

        out_ref[...] += (jnp.where(lane == _FOCAL_CORR, corr, 0.0)
                         + jnp.where(lane == _CARD, card_sum, 0.0))


def fused_losses_pallas(pred_logits, corr_logits, src_boxes, tgt_boxes,
                        src_texts_2d, tgt_texts_2d, x_logits_2d, chars_2d,
                        mean_qc, tgt_lengths, img_feat, text_feat_3, logit_scale,
                        *, alpha, gamma, ncores=2):
    B, Q, P, C = pred_logits.shape
    M = src_boxes.shape[0]
    MT, V = src_texts_2d.shape
    BL, Vc = x_logits_2d.shape

    # --- lane-dense flattening of the focal bulk term (one-hot == 0) --------
    n_elem = B * Q * P * C
    useful_rows = _cdiv(n_elem, 128)
    rows_per_core = _cdiv(useful_rows, ncores)
    rows_blk = min(_round_up(rows_per_core, 8), 2048)
    nsteps = _cdiv(rows_per_core, rows_blk)
    total_rows = ncores * nsteps * rows_blk

    flat = jnp.reshape(pred_logits, (n_elem,))
    pad = total_rows * 128 - n_elem
    if pad:
        # -1e4 makes focal(x, 0) exactly 0 for every padded element
        flat = jnp.concatenate([flat, jnp.full((pad,), -1e4, flat.dtype)], axis=0)
    flat2d = flat.reshape(total_rows, 128)

    # --- per-core row slices of the text / char CE inputs -------------------
    rows_txt = _round_up(_cdiv(MT, ncores), 8)
    rows_chr = _round_up(_cdiv(BL, ncores), 8)
    txt2d = _pad_rows(src_texts_2d, ncores * rows_txt)
    txttg = _pad_rows(tgt_texts_2d.astype(jnp.int32), ncores * rows_txt)
    chr2d = _pad_rows(x_logits_2d, ncores * rows_chr)
    chrtg = _pad_rows(chars_2d.astype(jnp.int32), ncores * rows_chr)

    # --- lane-major boxes: [8, Mb] with src rows 0..3, tgt rows 4..7 --------
    Mb = max(_round_up(M, 128), 128)
    unit = jnp.array([[0.5, 0.5, 1.0, 1.0]], F32)            # zero-loss padding box

    def _prep_boxes(bx):
        bx = bx.astype(F32)
        if Mb > M:
            bx = jnp.concatenate([bx, jnp.broadcast_to(unit, (Mb - M, 4))], 0)
        return bx.T                                           # (4, Mb)

    boxT = jnp.concatenate([_prep_boxes(src_boxes), _prep_boxes(tgt_boxes)], 0)

    corr2d = corr_logits.reshape(1, -1).astype(F32)           # (1, M*P)
    scale = jnp.reshape(logit_scale, (1,)).astype(F32)        # SMEM scalar
    lens2d = tgt_lengths.reshape(B, 1).astype(F32)

    kern = functools.partial(
        _fused_loss_kernel, alpha=float(alpha), gamma=float(gamma),
        nsteps=nsteps, n_txt_valid=MT, n_chr_valid=BL, n_box_valid=M)

    def _resident(shape):
        nd = len(shape)
        return pl.BlockSpec(shape, lambda i, j, _n=nd: (0,) * _n)

    grid_spec = pltpu.PrefetchScalarGridSpec(
        num_scalar_prefetch=0,
        grid=(ncores, nsteps),
        in_specs=[
            pl.BlockSpec((rows_blk, 128), lambda i, j: (i * nsteps + j, 0)),
            _resident(corr2d.shape),
            _resident(boxT.shape),
            pl.BlockSpec((rows_txt, V), lambda i, j: (i, 0)),   # core-sliced rows
            pl.BlockSpec((rows_txt, 1), lambda i, j: (i, 0)),
            pl.BlockSpec((rows_chr, Vc), lambda i, j: (i, 0)),  # core-sliced rows
            pl.BlockSpec((rows_chr, 1), lambda i, j: (i, 0)),
            _resident(mean_qc.shape),
            _resident(lens2d.shape),
            _resident(img_feat.shape),
            _resident(text_feat_3.shape),
            pl.BlockSpec(memory_space=pltpu.MemorySpace.SMEM),  # logit_scale
        ],
        out_specs=pl.BlockSpec((None, 1, 128), lambda i, j: (i, 0, 0)),
        scratch_shapes=[pltpu.VMEM((1, 128), F32)],
    )

    # size the VMEM allowance from the actual blocks (+headroom), valid on all gens
    def _nbytes(arr):
        return int(math.prod(arr.shape)) * jnp.dtype(arr.dtype).itemsize

    block_bytes = (
        2 * rows_blk * 128 * jnp.dtype(flat2d.dtype).itemsize
        + 2 * (rows_txt * (V * jnp.dtype(txt2d.dtype).itemsize + 4)
               + rows_chr * (Vc * jnp.dtype(chr2d.dtype).itemsize + 4))
        + 2 * (_nbytes(corr2d) + _nbytes(boxT) + _nbytes(mean_qc)
               + _nbytes(lens2d) + _nbytes(img_feat) + _nbytes(text_feat_3))
        + 3 * 128 * 4)
    vmem_limit = int(min(max(2 * block_bytes + (8 << 20), 16 << 20), 48 << 20))

    out = pl.pallas_call(
        kern,
        grid_spec=grid_spec,
        out_shape=jax.ShapeDtypeStruct((ncores, 1, 128), F32),
        compiler_params=pltpu.CompilerParams(
            dimension_semantics=("parallel", "arbitrary"),
            vmem_limit_bytes=vmem_limit),
    )(flat2d, corr2d, boxT, txt2d, txttg, chr2d, chrtg,
      mean_qc, lens2d, img_feat, text_feat_3, scale)

    return jnp.sum(out, axis=0)[0]                            # (128,) packed vector


# --------------------------------------------------------------------------
# Criterion (forward pass, eval-mode semantics)
# --------------------------------------------------------------------------

class SetCriterionWithTextPallas:
    def __init__(self, num_classes, num_ctrl_points, focal_alpha=0.25,
                 focal_gamma=2.0, box_jitter=0.1):
        self.num_classes = num_classes
        self.num_ctrl_points = num_ctrl_points
        self.focal_alpha = focal_alpha
        self.focal_gamma = focal_gamma
        self.box_jitter = box_jitter
        self.hung_match_ratio = 5
        self.dec_losses = ['labels', 'cardinality', 'boxes', 'texts', 'ctrl_points']
        self.img_losses = ['img_cls', 'img_clip']

    def __call__(self, outputs, targets):
        # TODO(synk): Hungarian matching (enc/dec matchers) and the training-time
        # box-jitter / hung_match_ratio replication are host-side data-dependent
        # ops; replaced by a deterministic identity assignment (eval semantics).
        pred_logits = outputs['pred_logits']
        B, Q, P, C = pred_logits.shape
        N = targets[0]['labels'].shape[0]
        M = B * N
        batch_idx = jnp.repeat(jnp.arange(B), N)
        src_idx = jnp.tile(jnp.arange(N), B)
        num_inst = max(float(M), 1.0)                         # clamp(num_inst, min=1)

        labels_o = jnp.concatenate([t['labels'] for t in targets]).astype(jnp.int32)

        # matched-pair gathers (host glue, small)
        src_l = pred_logits[batch_idx, src_idx]               # [M, P, C]
        corr_x = jnp.take_along_axis(
            src_l, labels_o[:, None, None], axis=2)[..., 0]   # [M, P]

        src_boxes = outputs['pred_boxes'][batch_idx, src_idx]  # [M, 4]
        tgt_boxes = jnp.concatenate([t['boxes'] for t in targets], axis=0)

        src_texts = outputs['pred_texts'][batch_idx, src_idx]  # [M, T, V]
        Mm, T, V = src_texts.shape
        tgt_texts = jnp.concatenate([t['texts'] for t in targets], axis=0)

        chars = jnp.stack([t['chars'] for t in targets], axis=0)  # [B, L]
        L = chars.shape[1]
        Vc = outputs['x_logits'].shape[-1]

        # cardinality is a logging-only metric: the ctrl-point mean is a tiny
        # host reduction feeding the kernel; the argmax/L1 part stays in-kernel.
        mean_qc = jnp.mean(pred_logits, axis=2)                # [B, Q, C]
        tgt_lengths = jnp.array([t['labels'].shape[0] for t in targets], F32)

        img = outputs['img_feature_s']                         # [Bc, D]
        Bc, D = img.shape
        txt3 = outputs['text_features'].reshape(3, Bc, D)      # r/s/e stacked

        res = fused_losses_pallas(
            pred_logits, corr_x, src_boxes, tgt_boxes,
            src_texts.reshape(Mm * T, V), tgt_texts.reshape(Mm * T, 1),
            outputs['x_logits'].reshape(B * L, Vc), chars.reshape(B * L, 1),
            mean_qc, tgt_lengths, img, txt3, outputs['logit_scale'],
            alpha=self.focal_alpha, gamma=self.focal_gamma)

        focal_sum = res[_FOCAL_BULK] + res[_FOCAL_CORR]
        losses = {}
        # reference: sigmoid_focal_loss = sum/(Q*P)/num_inst, then * Q  => sum/(P*num_inst)
        losses['loss_ce'] = focal_sum / (P * num_inst)
        losses['cardinality_error'] = res[_CARD] / B
        losses['loss_bbox'] = res[_L1] / num_inst
        losses['loss_giou'] = res[_GIOU] / num_inst
        # TODO(synk): reference loss_ctrl_points also reads outputs['pred_boxes'],
        # so it equals the L1 box numerator here (no separate ctrl-point head).
        losses['loss_ctrl_points'] = res[_L1] / num_inst
        # reference F.cross_entropy has no ignore_index => unmasked mean over M*T
        losses['loss_texts'] = res[_TEXT_SUM] / float(Mm * T)
        losses['loss_char'] = res[_CHAR_SUM] / jnp.maximum(res[_CHAR_CNT], 1.0)
        losses['loss_clip'] = res[_CLIP]

        # class_error is logging-only (accuracy helper): plain JAX.
        acc = jnp.mean((jnp.argmax(src_l, axis=-1) == labels_o[:, None])
                       .astype(F32)) * 100.0
        losses['class_error'] = 100.0 - acc

        # TODO(synk): 'aux_outputs' / 'enc_outputs' branches re-run the same loss
        # set on auxiliary decoder / encoder heads; omitted in this setup.
        return losses


# --------------------------------------------------------------------------
# Example run
# --------------------------------------------------------------------------

if __name__ == "__main__":
    key = jax.random.PRNGKey(0)
    B, Q, P, C = 2, 8, 4, 4            # batch, queries, ctrl points, classes
    N, T, V = 4, 8, 32                 # targets/img, text len, text vocab
    L, Vc, D = 16, 32, 128             # char seq len, char vocab, clip feature dim

    ks = jax.random.split(key, 12)
    img_f = jax.random.normal(ks[4], (B, D), F32)
    img_f = img_f / jnp.linalg.norm(img_f, axis=-1, keepdims=True)
    txt_f = jax.random.normal(ks[5], (3 * B, D), F32)
    txt_f = txt_f / jnp.linalg.norm(txt_f, axis=-1, keepdims=True)

    outputs = {
        'pred_logits': jax.random.normal(ks[0], (B, Q, P, C), F32),
        'pred_boxes': jax.nn.sigmoid(jax.random.normal(ks[1], (B, Q, 4), F32)),
        'pred_texts': jax.random.normal(ks[2], (B, Q, T, V), F32),
        'x_logits': jax.random.normal(ks[3], (B, L, Vc), F32),
        'img_feature_s': img_f,
        'text_features': txt_f,
        'logit_scale': jnp.asarray(10.0, F32),
    }

    targets = []
    for i in range(B):
        kt = jax.random.split(ks[6 + i], 5)
        centers = jax.random.uniform(kt[0], (N, 2), F32, 0.2, 0.8)
        sizes = jax.random.uniform(kt[1], (N, 2), F32, 0.05, 0.3)
        chars = jax.random.randint(kt[4], (L,), 0, Vc).at[0].set(3)
        targets.append({
            'labels': jax.random.randint(kt[2], (N,), 0, C),
            'boxes': jnp.concatenate([centers, sizes], axis=-1),
            'texts': jax.random.randint(kt[3], (N, T), 0, V),
            'chars': chars,
        })

    criterion = SetCriterionWithTextPallas(num_classes=C, num_ctrl_points=P)
    losses = jax.block_until_ready(criterion(outputs, targets))
    for name, val in sorted(losses.items()):
        assert bool(jnp.isfinite(val)), name
    print("KERNEL_OK")
</pallas_src>

<mosaic_0001>
module attributes {stable_mosaic.version = 11 : i64} {
  func.func @_fused_loss_kernel(%arg0: i32, %arg1: i32, %arg2: memref<8x128xf32, #tpu.memory_space<vmem>>, %arg3: memref<1x32xf32, #tpu.memory_space<vmem>>, %arg4: memref<8x128xf32, #tpu.memory_space<vmem>>, %arg5: memref<32x32xf32, #tpu.memory_space<vmem>>, %arg6: memref<32x1xi32, #tpu.memory_space<vmem>>, %arg7: memref<16x32xf32, #tpu.memory_space<vmem>>, %arg8: memref<16x1xi32, #tpu.memory_space<vmem>>, %arg9: memref<2x8x4xf32, #tpu.memory_space<vmem>>, %arg10: memref<2x1xf32, #tpu.memory_space<vmem>>, %arg11: memref<2x128xf32, #tpu.memory_space<vmem>>, %arg12: memref<3x2x128xf32, #tpu.memory_space<vmem>>, %arg13: memref<1xf32, #tpu.memory_space<smem>>, %arg14: memref<1x1x128xf32, #tpu.memory_space<vmem>>, %arg15: memref<1x128xf32, #tpu.memory_space<vmem>>) attributes {dimension_semantics = [#tpu.dimension_semantics<parallel>, #tpu.dimension_semantics<arbitrary>], iteration_bounds = array<i64: 2, 1>, scalar_prefetch = 0 : i64, scratch_operands = 1 : i64, tpu.core_type = #tpu.core_type<tc>, window_params = [{transform_indices = @transform_0, window_bounds = array<i64: 8, 128>}, {pipeline_mode = #tpu.pipeline_mode<synchronous>, transform_indices = @transform_1, window_bounds = array<i64: 1, 32>}, {pipeline_mode = #tpu.pipeline_mode<synchronous>, transform_indices = @transform_2, window_bounds = array<i64: 8, 128>}, {transform_indices = @transform_3, window_bounds = array<i64: 32, 32>}, {transform_indices = @transform_4, window_bounds = array<i64: 32, 1>}, {transform_indices = @transform_5, window_bounds = array<i64: 16, 32>}, {transform_indices = @transform_6, window_bounds = array<i64: 16, 1>}, {pipeline_mode = #tpu.pipeline_mode<synchronous>, transform_indices = @transform_7, window_bounds = array<i64: 2, 8, 4>}, {pipeline_mode = #tpu.pipeline_mode<synchronous>, transform_indices = @transform_8, window_bounds = array<i64: 2, 1>}, {pipeline_mode = #tpu.pipeline_mode<synchronous>, transform_indices = @transform_9, window_bounds = array<i64: 2, 128>}, {pipeline_mode = #tpu.pipeline_mode<synchronous>, transform_indices = @transform_10, window_bounds = array<i64: 3, 2, 128>}, {transform_indices = @transform_11, window_bounds = array<i64: 1>}, {transform_indices = @transform_12, window_bounds = array<i64: 1, 1, 128>}]} {
    %c0_i32 = arith.constant 0 : i32
    %0 = arith.cmpi eq, %arg1, %c0_i32 : i32
    %1 = arith.extui %0 : i1 to i32
    %c0_i32_0 = arith.constant 0 : i32
    %2 = arith.cmpi ne, %1, %c0_i32_0 : i32
    scf.if %2 {
      %cst_19 = arith.constant 0.000000e+00 : f32
      %43 = vector.broadcast %cst_19 : f32 to vector<1x128xf32>
      %c0_20 = arith.constant 0 : index
      %c0_21 = arith.constant 0 : index
      %44 = vector.load %arg15[%c0_20, %c0_21] : memref<1x128xf32, #tpu.memory_space<vmem>>, vector<1x128xf32>
      tpu.vector_store %arg15[%c0_20, %c0_21], %43 {strides = array<i32>} : memref<1x128xf32, #tpu.memory_space<vmem>>, vector<1x128xf32>,
    } else {
    }
    %c0 = arith.constant 0 : index
    %c0_1 = arith.constant 0 : index
    %3 = vector.load %arg2[%c0, %c0_1] : memref<8x128xf32, #tpu.memory_space<vmem>>, vector<8x128xf32>
    %4 = math.absf %3 : vector<8x128xf32>
    %cst = arith.constant 0.000000e+00 : f32
    %5 = vector.broadcast %cst : f32 to vector<8x128xf32>
    %6 = arith.subf %5, %4 : vector<8x128xf32>
    %7 = math.exp %6 : vector<8x128xf32>
    %cst_2 = arith.constant 0.000000e+00 : f32
    %8 = vector.broadcast %cst_2 : f32 to vector<8x128xf32>
    %9 = arith.maximumf %3, %8 : vector<8x128xf32>
    %cst_3 = arith.constant 1.000000e+00 : f32
    %10 = vector.broadcast %cst_3 : f32 to vector<8x128xf32>
    %11 = arith.addf %10, %7 : vector<8x128xf32>
    %12 = math.log %11 : vector<8x128xf32>
    %13 = arith.addf %9, %12 : vector<8x128xf32>
    %cst_4 = arith.constant 1.000000e+00 : f32
    %14 = vector.broadcast %cst_4 : f32 to vector<8x128xf32>
    %15 = arith.addf %14, %7 : vector<8x128xf32>
    %16 = tpu.reciprocal %15 {approx = true} : vector<8x128xf32> -> vector<8x128xf32>
    %cst_5 = arith.constant 0.000000e+00 : f32
    %17 = vector.broadcast %cst_5 : f32 to vector<8x128xf32>
    %18 = arith.cmpf oge, %3, %17 : vector<8x128xf32>
    %19 = arith.mulf %7, %16 : vector<8x128xf32>
    %20 = arith.select %18, %16, %19 : vector<8x128xi1>, vector<8x128xf32>
    %21 = arith.mulf %20, %20 : vector<8x128xf32>
    %22 = arith.mulf %21, %13 : vector<8x128xf32>
    %cst_6 = arith.constant 7.500000e-01 : f32
    %23 = vector.broadcast %cst_6 : f32 to vector<8x128xf32>
    %24 = arith.mulf %23, %22 : vector<8x128xf32>
    %c0_7 = arith.constant 0 : index
    %c0_8 = arith.constant 0 : index
    %25 = vector.load %arg15[%c0_7, %c0_8] : memref<1x128xf32, #tpu.memory_space<vmem>>, vector<1x128xf32>
    %cst_9 = arith.constant dense<0.000000e+00> : vector<128xf32>
    %26 = vector.multi_reduction <add>, %24, %cst_9 [0] : vector<8x128xf32> to vector<128xf32>
    %27 = vector.shape_cast %26 : vector<128xf32> to vector<1x128xf32>
    %28 = arith.addf %25, %27 : vector<1x128xf32>
    %c0_10 = arith.constant 0 : index
    %c0_11 = arith.constant 0 : index
    %29 = vector.load %arg15[%c0_10, %c0_11] : memref<1x128xf32, #tpu.memory_space<vmem>>, vector<1x128xf32>
    tpu.vector_store %arg15[%c0_10, %c0_11], %28 {strides = array<i32>} : memref<1x128xf32, #tpu.memory_space<vmem>>, vector<1x128xf32>,
    %c0_i32_12 = arith.constant 0 : i32
    %30 = arith.cmpi eq, %arg1, %c0_i32_12 : i32
    %31 = arith.extui %30 : i1 to i32
    %c0_i32_13 = arith.constant 0 : i32
    %32 = arith.cmpi ne, %31, %c0_i32_13 : i32
    scf.if %32 {
      %43 = tpu.iota {dimensions = array<i32: 1>} : vector<1x128xi32>
      %c0_19 = arith.constant 0 : index
      %c0_20 = arith.constant 0 : index
      %44 = vector.load %arg5[%c0_19, %c0_20] : memref<32x32xf32, #tpu.memory_space<vmem>>, vector<32x32xf32>
      %c32_i32 = arith.constant 32 : i32
      %45 = arith.muli %arg0, %c32_i32 : i32
      %46 = tpu.iota {dimensions = array<i32: 0>} : vector<32x1xi32>
      %47 = vector.broadcast %45 : i32 to vector<32x1xi32>
      %48 = arith.addi %47, %46 : vector<32x1xi32>
      %c64_i32 = arith.constant 64 : i32
      %49 = vector.broadcast %c64_i32 : i32 to vector<32x1xi32>
      %50 = arith.cmpi slt, %48, %49 : vector<32x1xi32>
      %51 = arith.extui %50 : vector<32x1xi1> to vector<32x1xi32>
      %52 = arith.sitofp %51 : vector<32x1xi32> to vector<32x1xf32>
      %c0_21 = arith.constant 0 : index
      %c0_22 = arith.constant 0 : index
      %53 = vector.load %arg6[%c0_21, %c0_22] : memref<32x1xi32, #tpu.memory_space<vmem>>, vector<32x1xi32>
      %cst_23 = arith.constant dense<0xFF800000> : vector<32xf32>
      %54 = vector.multi_reduction <maximumf>, %44, %cst_23 [1] : vector<32x32xf32> to vector<32xf32>
      %55 = vector.shape_cast %54 : vector<32xf32> to vector<32x1xf32>
      %56 = vector.broadcast %55 : vector<32x1xf32> to vector<32x32xf32>
      %57 = arith.subf %44, %56 : vector<32x32xf32>
      %58 = math.exp %57 : vector<32x32xf32>
      %cst_24 = arith.constant dense<0.000000e+00> : vector<32xf32>
      %59 = vector.multi_reduction <add>, %58, %cst_24 [1] : vector<32x32xf32> to vector<32xf32>
      %60 = vector.shape_cast %59 : vector<32xf32> to vector<32x1xf32>
      %61 = math.log %60 : vector<32x1xf32>
      %62 = arith.addf %55, %61 : vector<32x1xf32>
      %63 = tpu.iota {dimensions = array<i32: 1>} : vector<32x32xi32>
      %64 = vector.broadcast %53 : vector<32x1xi32> to vector<32x32xi32>
      %65 = arith.cmpi eq, %63, %64 : vector<32x32xi32>
      %cst_25 = arith.constant 0.000000e+00 : f32
      %66 = vector.broadcast %cst_25 : f32 to vector<32x32xf32>
      %67 = arith.select %65, %44, %66 : vector<32x32xi1>, vector<32x32xf32>
      %cst_26 = arith.constant dense<0.000000e+00> : vector<32xf32>
      %68 = vector.multi_reduction <add>, %67, %cst_26 [1] : vector<32x32xf32> to vector<32xf32>
      %69 = vector.shape_cast %68 : vector<32xf32> to vector<32x1xf32>
      %70 = arith.subf %62, %69 : vector<32x1xf32>
      %71 = arith.mulf %70, %52 : vector<32x1xf32>
      %72 = vector.shape_cast %71 : vector<32x1xf32> to vector<1x32x1xf32>
      %cst_27 = arith.constant dense<0.000000e+00> : vector<1xf32>
      %73 = vector.multi_reduction <add>, %72, %cst_27 [1, 2] : vector<1x32x1xf32> to vector<1xf32>
      %74 = vector.shape_cast %73 : vector<1xf32> to vector<1x1x1xf32>
      %75 = vector.extract %74[0, 0, 0] : f32 from vector<1x1x1xf32>
      %c0_28 = arith.constant 0 : index
      %c0_29 = arith.constant 0 : index
      %76 = vector.load %arg7[%c0_28, %c0_29] : memref<16x32xf32, #tpu.memory_space<vmem>>, vector<16x32xf32>
      %c0_30 = arith.constant 0 : index
      %c0_31 = arith.constant 0 : index
      %77 = vector.load %arg8[%c0_30, %c0_31] : memref<16x1xi32, #tpu.memory_space<vmem>>, vector<16x1xi32>
      %c16_i32 = arith.constant 16 : i32
      %78 = arith.muli %arg0, %c16_i32 : i32
      %79 = tpu.iota {dimensions = array<i32: 0>} : vector<16x1xi32>
      %80 = vector.broadcast %78 : i32 to vector<16x1xi32>
      %81 = arith.addi %80, %79 : vector<16x1xi32>
      %c32_i32_32 = arith.constant 32 : i32
      %82 = vector.broadcast %c32_i32_32 : i32 to vector<16x1xi32>
      %83 = arith.cmpi slt, %81, %82 : vector<16x1xi32>
      %c0_i32_33 = arith.constant 0 : i32
      %84 = vector.broadcast %c0_i32_33 : i32 to vector<16x1xi32>
      %85 = arith.cmpi ne, %77, %84 : vector<16x1xi32>
      %86 = arith.andi %83, %85 : vector<16x1xi1>
      %87 = arith.extui %86 : vector<16x1xi1> to vector<16x1xi32>
      %88 = arith.sitofp %87 : vector<16x1xi32> to vector<16x1xf32>
      %cst_34 = arith.constant dense<0xFF800000> : vector<16xf32>
      %89 = vector.multi_reduction <maximumf>, %76, %cst_34 [1] : vector<16x32xf32> to vector<16xf32>
      %90 = vector.shape_cast %89 : vector<16xf32> to vector<16x1xf32>
      %91 = vector.broadcast %90 : vector<16x1xf32> to vector<16x32xf32>
      %92 = arith.subf %76, %91 : vector<16x32xf32>
      %93 = math.exp %92 : vector<16x32xf32>
      %cst_35 = arith.constant dense<0.000000e+00> : vector<16xf32>
      %94 = vector.multi_reduction <add>, %93, %cst_35 [1] : vector<16x32xf32> to vector<16xf32>
      %95 = vector.shape_cast %94 : vector<16xf32> to vector<16x1xf32>
      %96 = math.log %95 : vector<16x1xf32>
      %97 = arith.addf %90, %96 : vector<16x1xf32>
      %98 = tpu.iota {dimensions = array<i32: 1>} : vector<16x32xi32>
      %99 = vector.broadcast %77 : vector<16x1xi32> to vector<16x32xi32>
      %100 = arith.cmpi eq, %98, %99 : vector<16x32xi32>
      %cst_36 = arith.constant 0.000000e+00 : f32
      %101 = vector.broadcast %cst_36 : f32 to vector<16x32xf32>
      %102 = arith.select %100, %76, %101 : vector<16x32xi1>, vector<16x32xf32>
      %cst_37 = arith.constant dense<0.000000e+00> : vector<16xf32>
      %103 = vector.multi_reduction <add>, %102, %cst_37 [1] : vector<16x32xf32> to vector<16xf32>
      %104 = vector.shape_cast %103 : vector<16xf32> to vector<16x1xf32>
      %105 = arith.subf %97, %104 : vector<16x1xf32>
      %106 = arith.mulf %105, %88 : vector<16x1xf32>
      %107 = vector.shape_cast %106 : vector<16x1xf32> to vector<1x16x1xf32>
      %cst_38 = arith.constant dense<0.000000e+00> : vector<1xf32>
      %108 = vector.multi_reduction <add>, %107, %cst_38 [1, 2] : vector<1x16x1xf32> to vector<1xf32>
      %109 = vector.shape_cast %108 : vector<1xf32> to vector<1x1x1xf32>
      %110 = vector.extract %109[0, 0, 0] : f32 from vector<1x1x1xf32>
      %111 = vector.shape_cast %88 : vector<16x1xf32> to vector<1x16x1xf32>
      %cst_39 = arith.constant dense<0.000000e+00> : vector<1xf32>
      %112 = vector.multi_reduction <add>, %111, %cst_39 [1, 2] : vector<1x16x1xf32> to vector<1xf32>
      %113 = vector.shape_cast %112 : vector<1xf32> to vector<1x1x1xf32>
      %114 = vector.extract %113[0, 0, 0] : f32 from vector<1x1x1xf32>
      %c0_i32_40 = arith.constant 0 : i32
      %115 = vector.broadcast %c0_i32_40 : i32 to vector<1x128xi32>
      %116 = arith.cmpi eq, %43, %115 : vector<1x128xi32>
      %c0_41 = arith.constant 0 : index
      %c0_42 = arith.constant 0 : index
      %117 = vector.load %arg15[%c0_41, %c0_42] : memref<1x128xf32, #tpu.memory_space<vmem>>, vector<1x128xf32>
      %118 = vector.shape_cast %117 : vector<1x128xf32> to vector<1x1x128xf32>
      %cst_43 = arith.constant dense<0.000000e+00> : vector<1xf32>
      %119 = vector.multi_reduction <add>, %118, %cst_43 [1, 2] : vector<1x1x128xf32> to vector<1xf32>
      %120 = vector.shape_cast %119 : vector<1xf32> to vector<1x1x1xf32>
      %121 = vector.extract %120[0, 0, 0] : f32 from vector<1x1x1xf32>
      %cst_44 = arith.constant 0.000000e+00 : f32
      %122 = vector.broadcast %121 : f32 to vector<1x128xf32>
      %123 = vector.broadcast %cst_44 : f32 to vector<1x128xf32>
      %124 = arith.select %116, %122, %123 : vector<1x128xi1>, vector<1x128xf32>
      %c5_i32 = arith.constant 5 : i32
      %125 = vector.broadcast %c5_i32 : i32 to vector<1x128xi32>
      %126 = arith.cmpi eq, %43, %125 : vector<1x128xi32>
      %cst_45 = arith.constant 0.000000e+00 : f32
      %127 = vector.broadcast %75 : f32 to vector<1x128xf32>
      %128 = vector.broadcast %cst_45 : f32 to vector<1x128xf32>
      %129 = arith.select %126, %127, %128 : vector<1x128xi1>, vector<1x128xf32>
      %130 = arith.addf %124, %129 : vector<1x128xf32>
      %c6_i32 = arith.constant 6 : i32
      %131 = vector.broadcast %c6_i32 : i32 to vector<1x128xi32>
      %132 = arith.cmpi eq, %43, %131 : vector<1x128xi32>
      %cst_46 = arith.constant 0.000000e+00 : f32
      %133 = vector.broadcast %110 : f32 to vector<1x128xf32>
      %134 = vector.broadcast %cst_46 : f32 to vector<1x128xf32>
      %135 = arith.select %132, %133, %134 : vector<1x128xi1>, vector<1x128xf32>
      %136 = arith.addf %130, %135 : vector<1x128xf32>
      %c7_i32 = arith.constant 7 : i32
      %137 = vector.broadcast %c7_i32 : i32 to vector<1x128xi32>
      %138 = arith.cmpi eq, %43, %137 : vector<1x128xi32>
      %cst_47 = arith.constant 0.000000e+00 : f32
      %139 = vector.broadcast %114 : f32 to vector<1x128xf32>
      %140 = vector.broadcast %cst_47 : f32 to vector<1x128xf32>
      %141 = arith.select %138, %139, %140 : vector<1x128xi1>, vector<1x128xf32>
      %142 = arith.addf %136, %141 : vector<1x128xf32>
      %c0_48 = arith.constant 0 : index
      %c0_49 = arith.constant 0 : index
      %c0_50 = arith.constant 0 : index
      %143 = vector.load %arg14[%c0_48, %c0_49, %c0_50] : memref<1x1x128xf32, #tpu.memory_space<vmem>>, vector<1x1x128xf32>
      %144 = vector.shape_cast %143 : vector<1x1x128xf32> to vector<1x128xf32>
      %145 = vector.shape_cast %142 : vector<1x128xf32> to vector<1x1x128xf32>
      tpu.vector_store %arg14[%c0_48, %c0_49, %c0_50], %145 {strides = array<i32>} : memref<1x1x128xf32, #tpu.memory_space<vmem>>, vector<1x1x128xf32>,
    } else {
    }
    %c0_i32_14 = arith.constant 0 : i32
    %33 = arith.cmpi eq, %arg1, %c0_i32_14 : i32
    %c0_i32_15 = arith.constant 0 : i32
    %34 = arith.cmpi eq, %arg0, %c0_i32_15 : i32
    %35 = arith.andi %33, %34 : i1
    %36 = arith.extui %35 : i1 to i32
    %c0_i32_16 = arith.constant 0 : i32
    %37 = arith.cmpi ne, %36, %c0_i32_16 : i32
    scf.if %37 {
      %43 = tpu.iota {dimensions = array<i32: 1>} : vector<1x128xi32>
      %c0_19 = arith.constant 0 : index
      %c0_20 = arith.constant 0 : index
      %44 = vector.load %arg4[%c0_19, %c0_20] : memref<8x128xf32, #tpu.memory_space<vmem>>, vector<8x128xf32>
      %45 = tpu.iota {dimensions = array<i32: 1>} : vector<1x128xi32>
      %c8_i32 = arith.constant 8 : i32
      %46 = vector.broadcast %c8_i32 : i32 to vector<1x128xi32>
      %47 = arith.cmpi slt, %45, %46 : vector<1x128xi32>
      %48 = arith.extui %47 : vector<1x128xi1> to vector<1x128xi32>
      %49 = arith.sitofp %48 : vector<1x128xi32> to vector<1x128xf32>
      %50 = vector.extract_strided_slice %44 {offsets = [0, 0], sizes = [4, 128], strides = [1, 1]} : vector<8x128xf32> to vector<4x128xf32>
      %51 = vector.extract_strided_slice %44 {offsets = [4, 0], sizes = [4, 128], strides = [1, 1]} : vector<8x128xf32> to vector<4x128xf32>
      %52 = arith.subf %50, %51 : vector<4x128xf32>
      %53 = math.absf %52 : vector<4x128xf32>
      %54 = vector.broadcast %49 : vector<1x128xf32> to vector<4x128xf32>
      %55 = arith.mulf %53, %54 : vector<4x128xf32>
      %56 = vector.shape_cast %55 : vector<4x128xf32> to vector<1x4x128xf32>
      %cst_21 = arith.constant dense<0.000000e+00> : vector<1xf32>
      %57 = vector.multi_reduction <add>, %56, %cst_21 [1, 2] : vector<1x4x128xf32> to vector<1xf32>
      %58 = vector.shape_cast %57 : vector<1xf32> to vector<1x1x1xf32>
      %59 = vector.extract %58[0, 0, 0] : f32 from vector<1x1x1xf32>
      %60 = vector.extract_strided_slice %44 {offsets = [0, 0], sizes = [1, 128], strides = [1, 1]} : vector<8x128xf32> to vector<1x128xf32>
      %61 = vector.extract_strided_slice %44 {offsets = [1, 0], sizes = [1, 128], strides = [1, 1]} : vector<8x128xf32> to vector<1x128xf32>
      %62 = vector.extract_strided_slice %44 {offsets = [2, 0], sizes = [1, 128], strides = [1, 1]} : vector<8x128xf32> to vector<1x128xf32>
      %63 = vector.extract_strided_slice %44 {offsets = [3, 0], sizes = [1, 128], strides = [1, 1]} : vector<8x128xf32> to vector<1x128xf32>
      %64 = vector.extract_strided_slice %44 {offsets = [4, 0], sizes = [1, 128], strides = [1, 1]} : vector<8x128xf32> to vector<1x128xf32>
      %65 = vector.extract_strided_slice %44 {offsets = [5, 0], sizes = [1, 128], strides = [1, 1]} : vector<8x128xf32> to vector<1x128xf32>
      %66 = vector.extract_strided_slice %44 {offsets = [6, 0], sizes = [1, 128], strides = [1, 1]} : vector<8x128xf32> to vector<1x128xf32>
      %67 = vector.extract_strided_slice %44 {offsets = [7, 0], sizes = [1, 128], strides = [1, 1]} : vector<8x128xf32> to vector<1x128xf32>
      %cst_22 = arith.constant 5.000000e-01 : f32
      %68 = vector.broadcast %cst_22 : f32 to vector<1x128xf32>
      %69 = arith.mulf %68, %62 : vector<1x128xf32>
      %70 = arith.subf %60, %69 : vector<1x128xf32>
      %cst_23 = arith.constant 5.000000e-01 : f32
      %71 = vector.broadcast %cst_23 : f32 to vector<1x128xf32>
      %72 = arith.mulf %71, %63 : vector<1x128xf32>
      %73 = arith.subf %61, %72 : vector<1x128xf32>
      %cst_24 = arith.constant 5.000000e-01 : f32
      %74 = vector.broadcast %cst_24 : f32 to vector<1x128xf32>
      %75 = arith.mulf %74, %62 : vector<1x128xf32>
      %76 = arith.addf %60, %75 : vector<1x128xf32>
      %cst_25 = arith.constant 5.000000e-01 : f32
      %77 = vector.broadcast %cst_25 : f32 to vector<1x128xf32>
      %78 = arith.mulf %77, %63 : vector<1x128xf32>
      %79 = arith.addf %61, %78 : vector<1x128xf32>
      %cst_26 = arith.constant 5.000000e-01 : f32
      %80 = vector.broadcast %cst_26 : f32 to vector<1x128xf32>
      %81 = arith.mulf %80, %66 : vector<1x128xf32>
      %82 = arith.subf %64, %81 : vector<1x128xf32>
      %cst_27 = arith.constant 5.000000e-01 : f32
      %83 = vector.broadcast %cst_27 : f32 to vector<1x128xf32>
      %84 = arith.mulf %83, %67 : vector<1x128xf32>
      %85 = arith.subf %65, %84 : vector<1x128xf32>
      %cst_28 = arith.constant 5.000000e-01 : f32
      %86 = vector.broadcast %cst_28 : f32 to vector<1x128xf32>
      %87 = arith.mulf %86, %66 : vector<1x128xf32>
      %88 = arith.addf %64, %87 : vector<1x128xf32>
      %cst_29 = arith.constant 5.000000e-01 : f32
      %89 = vector.broadcast %cst_29 : f32 to vector<1x128xf32>
      %90 = arith.mulf %89, %67 : vector<1x128xf32>
      %91 = arith.addf %65, %90 : vector<1x128xf32>
      %92 = arith.subf %76, %70 : vector<1x128xf32>
      %93 = arith.subf %79, %73 : vector<1x128xf32>
      %94 = arith.mulf %92, %93 : vector<1x128xf32>
      %95 = arith.subf %88, %82 : vector<1x128xf32>
      %96 = arith.subf %91, %85 : vector<1x128xf32>
      %97 = arith.mulf %95, %96 : vector<1x128xf32>
      %98 = arith.minimumf %76, %88 : vector<1x128xf32>
      %99 = arith.maximumf %70, %82 : vector<1x128xf32>
      %100 = arith.subf %98, %99 : vector<1x128xf32>
      %cst_30 = arith.constant 0.000000e+00 : f32
      %101 = vector.broadcast %cst_30 : f32 to vector<1x128xf32>
      %102 = arith.maximumf %100, %101 : vector<1x128xf32>
      %103 = arith.minimumf %79, %91 : vector<1x128xf32>
      %104 = arith.maximumf %73, %85 : vector<1x128xf32>
      %105 = arith.subf %103, %104 : vector<1x128xf32>
      %cst_31 = arith.constant 0.000000e+00 : f32
      %106 = vector.broadcast %cst_31 : f32 to vector<1x128xf32>
      %107 = arith.maximumf %105, %106 : vector<1x128xf32>
      %108 = arith.mulf %102, %107 : vector<1x128xf32>
      %109 = arith.addf %94, %97 : vector<1x128xf32>
      %110 = arith.subf %109, %108 : vector<1x128xf32>
      %cst_32 = arith.constant 1.000000e-07 : f32
      %111 = vector.broadcast %cst_32 : f32 to vector<1x128xf32>
      %112 = arith.addf %110, %111 : vector<1x128xf32>
      %113 = arith.divf %108, %112 : vector<1x128xf32>
      %114 = arith.maximumf %76, %88 : vector<1x128xf32>
      %115 = arith.minimumf %70, %82 : vector<1x128xf32>
      %116 = arith.subf %114, %115 : vector<1x128xf32>
      %117 = arith.maximumf %79, %91 : vector<1x128xf32>
      %118 = arith.minimumf %73, %85 : vector<1x128xf32>
      %119 = arith.subf %117, %118 : vector<1x128xf32>
      %120 = arith.mulf %116, %119 : vector<1x128xf32>
      %121 = arith.subf %120, %110 : vector<1x128xf32>
      %cst_33 = arith.constant 1.000000e-07 : f32
      %122 = vector.broadcast %cst_33 : f32 to vector<1x128xf32>
      %123 = arith.addf %120, %122 : vector<1x128xf32>
      %124 = arith.divf %121, %123 : vector<1x128xf32>
      %125 = arith.subf %113, %124 : vector<1x128xf32>
      %cst_34 = arith.constant 1.000000e+00 : f32
      %126 = vector.broadcast %cst_34 : f32 to vector<1x128xf32>
      %127 = arith.subf %126, %125 : vector<1x128xf32>
      %128 = arith.mulf %127, %49 : vector<1x128xf32>
      %129 = vector.shape_cast %128 : vector<1x128xf32> to vector<1x1x128xf32>
      %cst_35 = arith.constant dense<0.000000e+00> : vector<1xf32>
      %130 = vector.multi_reduction <add>, %129, %cst_35 [1, 2] : vector<1x1x128xf32> to vector<1xf32>
      %131 = vector.shape_cast %130 : vector<1xf32> to vector<1x1x1xf32>
      %132 = vector.extract %131[0, 0, 0] : f32 from vector<1x1x1xf32>
      %c0_36 = arith.constant 0 : index
      %c0_37 = arith.constant 0 : index
      %133 = vector.load %arg11[%c0_36, %c0_37] : memref<2x128xf32, #tpu.memory_space<vmem>>, vector<2x128xf32>
      %c0_38 = arith.constant 0 : index
      %c0_39 = arith.constant 0 : index
      %c0_40 = arith.constant 0 : index
      %134 = vector.load %arg12[%c0_38, %c0_39, %c0_40] : memref<3x2x128xf32, #tpu.memory_space<vmem>>, vector<3x2x128xf32>
      %cst_41 = arith.constant dense<0.000000e+00> : vector<2x128xf32>
      %135 = vector.multi_reduction <add>, %134, %cst_41 [0] : vector<3x2x128xf32> to vector<2x128xf32>
      %cst_42 = arith.constant 3.000000e+00 : f32
      %136 = vector.broadcast %cst_42 : f32 to vector<2x128xf32>
      %137 = arith.divf %135, %136 : vector<2x128xf32>
      %c0_43 = arith.constant 0 : index
      %138 = memref.load %arg13[%c0_43] : memref<1xf32, #tpu.memory_space<smem>>
      %cst_44 = arith.constant dense<0.000000e+00> : vector<2x2xf32>
      %139 = tpu.matmul %133, %137, %cst_44 {dimension_numbers = #tpu.dot_dimension_numbers<[1], [1], [0], [0], [0, 0, 1, 0], [], []>} : vector<2x128xf32>, vector<2x128xf32>, vector<2x2xf32> -> vector<2x2xf32>
      %140 = vector.broadcast %138 : f32 to vector<2x2xf32>
      %141 = arith.mulf %140, %139 : vector<2x2xf32>
      %142 = vector.shape_cast %141 : vector<2x2xf32> to vector<1x2x2xf32>
      %cst_45 = arith.constant dense<0xFF800000> : vector<1xf32>
      %143 = vector.multi_reduction <maximumf>, %142, %cst_45 [1, 2] : vector<1x2x2xf32> to vector<1xf32>
      %144 = vector.shape_cast %143 : vector<1xf32> to vector<1x1x1xf32>
      %145 = vector.extract %144[0, 0, 0] : f32 from vector<1x1x1xf32>
      %146 = vector.broadcast %145 : f32 to vector<2x2xf32>
      %147 = arith.subf %141, %146 : vector<2x2xf32>
      %148 = math.exp %147 : vector<2x2xf32>
      %149 = tpu.iota {dimensions = array<i32: 0>} : vector<2x2xi32>
      %150 = tpu.iota {dimensions = array<i32: 1>} : vector<2x2xi32>
      %151 = arith.cmpi eq, %149, %150 : vector<2x2xi32>
      %cst_46 = arith.constant 0.000000e+00 : f32
      %152 = vector.broadcast %cst_46 : f32 to vector<2x2xf32>
      %153 = arith.select %151, %141, %152 : vector<2x2xi1>, vector<2x2xf32>
      %cst_47 = arith.constant dense<0.000000e+00> : vector<2xf32>
      %154 = vector.multi_reduction <add>, %153, %cst_47 [1] : vector<2x2xf32> to vector<2xf32>
      %155 = vector.shape_cast %154 : vector<2xf32> to vector<2x1xf32>
      %156 = arith.cmpi eq, %149, %150 : vector<2x2xi32>
      %cst_48 = arith.constant 0.000000e+00 : f32
      %157 = vector.broadcast %cst_48 : f32 to vector<2x2xf32>
      %158 = arith.select %156, %141, %157 : vector<2x2xi1>, vector<2x2xf32>
      %cst_49 = arith.constant dense<0.000000e+00> : vector<2xf32>
      %159 = vector.multi_reduction <add>, %158, %cst_49 [0] : vector<2x2xf32> to vector<2xf32>
      %160 = vector.shape_cast %159 : vector<2xf32> to vector<1x2xf32>
      %cst_50 = arith.constant dense<0.000000e+00> : vector<2xf32>
      %161 = vector.multi_reduction <add>, %148, %cst_50 [1] : vector<2x2xf32> to vector<2xf32>
      %162 = vector.shape_cast %161 : vector<2xf32> to vector<2x1xf32>
      %cst_51 = arith.constant 1.000000e-30 : f32
      %163 = vector.broadcast %cst_51 : f32 to vector<2x1xf32>
      %164 = arith.maximumf %162, %163 : vector<2x1xf32>
      %165 = math.log %164 : vector<2x1xf32>
      %166 = vector.broadcast %145 : f32 to vector<2x1xf32>
      %167 = arith.addf %166, %165 : vector<2x1xf32>
      %cst_52 = arith.constant dense<0.000000e+00> : vector<2xf32>
      %168 = vector.multi_reduction <add>, %148, %cst_52 [0] : vector<2x2xf32> to vector<2xf32>
      %169 = vector.shape_cast %168 : vector<2xf32> to vector<1x2xf32>
      %cst_53 = arith.constant 1.000000e-30 : f32
      %170 = vector.broadcast %cst_53 : f32 to vector<1x2xf32>
      %171 = arith.maximumf %169, %170 : vector<1x2xf32>
      %172 = math.log %171 : vector<1x2xf32>
      %173 = vector.broadcast %145 : f32 to vector<1x2xf32>
      %174 = arith.addf %173, %172 : vector<1x2xf32>
      %175 = arith.subf %167, %155 : vector<2x1xf32>
      %176 = vector.shape_cast %175 : vector<2x1xf32> to vector<1x2x1xf32>
      %cst_54 = arith.constant dense<0.000000e+00> : vector<1xf32>
      %177 = vector.multi_reduction <add>, %176, %cst_54 [1, 2] : vector<1x2x1xf32> to vector<1xf32>
      %178 = vector.shape_cast %177 : vector<1xf32> to vector<1x1x1xf32>
      %179 = vector.extract %178[0, 0, 0] : f32 from vector<1x1x1xf32>
      %cst_55 = arith.constant 2.000000e+00 : f32
      %180 = arith.divf %179, %cst_55 : f32
      %181 = arith.subf %174, %160 : vector<1x2xf32>
      %182 = vector.shape_cast %181 : vector<1x2xf32> to vector<1x1x2xf32>
      %cst_56 = arith.constant dense<0.000000e+00> : vector<1xf32>
      %183 = vector.multi_reduction <add>, %182, %cst_56 [1, 2] : vector<1x1x2xf32> to vector<1xf32>
      %184 = vector.shape_cast %183 : vector<1xf32> to vector<1x1x1xf32>
      %185 = vector.extract %184[0, 0, 0] : f32 from vector<1x1x1xf32>
      %cst_57 = arith.constant 2.000000e+00 : f32
      %186 = arith.divf %185, %cst_57 : f32
      %187 = arith.addf %180, %186 : f32
      %cst_58 = arith.constant 5.000000e-01 : f32
      %188 = arith.mulf %cst_58, %187 : f32
      %c0_59 = arith.constant 0 : index
      %c0_60 = arith.constant 0 : index
      %c0_61 = arith.constant 0 : index
      %189 = vector.load %arg14[%c0_59, %c0_60, %c0_61] : memref<1x1x128xf32, #tpu.memory_space<vmem>>, vector<1x1x128xf32>
      %190 = vector.shape_cast %189 : vector<1x1x128xf32> to vector<1x128xf32>
      %c3_i32 = arith.constant 3 : i32
      %191 = vector.broadcast %c3_i32 : i32 to vector<1x128xi32>
      %192 = arith.cmpi eq, %43, %191 : vector<1x128xi32>
      %cst_62 = arith.constant 0.000000e+00 : f32
      %193 = vector.broadcast %59 : f32 to vector<1x128xf32>
      %194 = vector.broadcast %cst_62 : f32 to vector<1x128xf32>
      %195 = arith.select %192, %193, %194 : vector<1x128xi1>, vector<1x128xf32>
      %c4_i32 = arith.constant 4 : i32
      %196 = vector.broadcast %c4_i32 : i32 to vector<1x128xi32>
      %197 = arith.cmpi eq, %43, %196 : vector<1x128xi32>
      %cst_63 = arith.constant 0.000000e+00 : f32
      %198 = vector.broadcast %132 : f32 to vector<1x128xf32>
      %199 = vector.broadcast %cst_63 : f32 to vector<1x128xf32>
      %200 = arith.select %197, %198, %199 : vector<1x128xi1>, vector<1x128xf32>
      %201 = arith.addf %195, %200 : vector<1x128xf32>
      %c8_i32_64 = arith.constant 8 : i32
      %202 = vector.broadcast %c8_i32_64 : i32 to vector<1x128xi32>
      %203 = arith.cmpi eq, %43, %202 : vector<1x128xi32>
      %cst_65 = arith.constant 0.000000e+00 : f32
      %204 = vector.broadcast %188 : f32 to vector<1x128xf32>
      %205 = vector.broadcast %cst_65 : f32 to vector<1x128xf32>
      %206 = arith.select %203, %204, %205 : vector<1x128xi1>, vector<1x128xf32>
      %207 = arith.addf %201, %206 : vector<1x128xf32>
      %208 = arith.addf %190, %207 : vector<1x128xf32>
      %c0_66 = arith.constant 0 : index
      %c0_67 = arith.constant 0 : index
      %c0_68 = arith.constant 0 : index
      %209 = vector.load %arg14[%c0_66, %c0_67, %c0_68] : memref<1x1x128xf32, #tpu.memory_space<vmem>>, vector<1x1x128xf32>
      %210 = vector.shape_cast %209 : vector<1x1x128xf32> to vector<1x128xf32>
      %211 = vector.shape_cast %208 : vector<1x128xf32> to vector<1x1x128xf32>
      tpu.vector_store %arg14[%c0_66, %c0_67, %c0_68], %211 {strides = array<i32>} : memref<1x1x128xf32, #tpu.memory_space<vmem>>, vector<1x1x128xf32>,
    } else {
    }
    %c0_i32_17 = arith.constant 0 : i32
    %38 = arith.cmpi eq, %arg1, %c0_i32_17 : i32
    %c1_i32 = arith.constant 1 : i32
    %39 = arith.cmpi eq, %arg0, %c1_i32 : i32
    %40 = arith.andi %38, %39 : i1
    %41 = arith.extui %40 : i1 to i32
    %c0_i32_18 = arith.constant 0 : i32
    %42 = arith.cmpi ne, %41, %c0_i32_18 : i32
    scf.if %42 {
      %43 = tpu.iota {dimensions = array<i32: 1>} : vector<1x128xi32>
      %c0_19 = arith.constant 0 : index
      %c0_20 = arith.constant 0 : index
      %44 = vector.load %arg3[%c0_19, %c0_20] : memref<1x32xf32, #tpu.memory_space<vmem>>, vector<1x32xf32>
      %45 = math.absf %44 : vector<1x32xf32>
      %cst_21 = arith.constant 0.000000e+00 : f32
      %46 = vector.broadcast %cst_21 : f32 to vector<1x32xf32>
      %47 = arith.subf %46, %45 : vector<1x32xf32>
      %48 = math.exp %47 : vector<1x32xf32>
      %cst_22 = arith.constant 0.000000e+00 : f32
      %49 = vector.broadcast %cst_22 : f32 to vector<1x32xf32>
      %50 = arith.maximumf %44, %49 : vector<1x32xf32>
      %cst_23 = arith.constant 1.000000e+00 : f32
      %51 = vector.broadcast %cst_23 : f32 to vector<1x32xf32>
      %52 = arith.addf %51, %48 : vector<1x32xf32>
      %53 = math.log %52 : vector<1x32xf32>
      %54 = arith.addf %50, %53 : vector<1x32xf32>
      %cst_24 = arith.constant 1.000000e+00 : f32
      %55 = vector.broadcast %cst_24 : f32 to vector<1x32xf32>
      %56 = arith.addf %55, %48 : vector<1x32xf32>
      %57 = tpu.reciprocal %56 {approx = true} : vector<1x32xf32> -> vector<1x32xf32>
      %cst_25 = arith.constant 0.000000e+00 : f32
      %58 = vector.broadcast %cst_25 : f32 to vector<1x32xf32>
      %59 = arith.cmpf oge, %44, %58 : vector<1x32xf32>
      %60 = arith.mulf %48, %57 : vector<1x32xf32>
      %61 = arith.select %59, %57, %60 : vector<1x32xi1>, vector<1x32xf32>
      %cst_26 = arith.constant 1.000000e+00 : f32
      %62 = vector.broadcast %cst_26 : f32 to vector<1x32xf32>
      %63 = arith.subf %62, %61 : vector<1x32xf32>
      %64 = arith.mulf %63, %63 : vector<1x32xf32>
      %65 = arith.subf %54, %44 : vector<1x32xf32>
      %66 = arith.mulf %64, %65 : vector<1x32xf32>
      %67 = arith.mulf %61, %61 : vector<1x32xf32>
      %68 = arith.mulf %67, %54 : vector<1x32xf32>
      %cst_27 = arith.constant 2.500000e-01 : f32
      %69 = vector.broadcast %cst_27 : f32 to vector<1x32xf32>
      %70 = arith.mulf %69, %66 : vector<1x32xf32>
      %cst_28 = arith.constant 7.500000e-01 : f32
      %71 = vector.broadcast %cst_28 : f32 to vector<1x32xf32>
      %72 = arith.mulf %71, %68 : vector<1x32xf32>
      %73 = arith.subf %70, %72 : vector<1x32xf32>
      %74 = vector.shape_cast %73 : vector<1x32xf32> to vector<1x1x32xf32>
      %cst_29 = arith.constant dense<0.000000e+00> : vector<1xf32>
      %75 = vector.multi_reduction <add>, %74, %cst_29 [1, 2] : vector<1x1x32xf32> to vector<1xf32>
      %76 = vector.shape_cast %75 : vector<1xf32> to vector<1x1x1xf32>
      %77 = vector.extract %76[0, 0, 0] : f32 from vector<1x1x1xf32>
      %c0_30 = arith.constant 0 : index
      %c0_31 = arith.constant 0 : index
      %c0_32 = arith.constant 0 : index
      %78 = vector.load %arg9[%c0_30, %c0_31, %c0_32] : memref<2x8x4xf32, #tpu.memory_space<vmem>>, vector<2x8x4xf32>
      %79 = vector.extract_strided_slice %78 {offsets = [0, 0, 0], sizes = [2, 8, 1], strides = [1, 1, 1]} : vector<2x8x4xf32> to vector<2x8x1xf32>
      %cst_33 = arith.constant dense<0xFF800000> : vector<2x8xf32>
      %80 = vector.multi_reduction <maximumf>, %78, %cst_33 [2] : vector<2x8x4xf32> to vector<2x8xf32>
      %81 = vector.shape_cast %80 : vector<2x8xf32> to vector<2x8x1xf32>
      %82 = arith.cmpf oge, %79, %81 : vector<2x8x1xf32>
      %83 = arith.extui %82 : vector<2x8x1xi1> to vector<2x8x1xi32>
      %84 = arith.sitofp %83 : vector<2x8x1xi32> to vector<2x8x1xf32>
      %cst_34 = arith.constant dense<0.000000e+00> : vector<2x1xf32>
      %85 = vector.multi_reduction <add>, %84, %cst_34 [1] : vector<2x8x1xf32> to vector<2x1xf32>
      %c0_35 = arith.constant 0 : index
      %c0_36 = arith.constant 0 : index
      %86 = vector.load %arg10[%c0_35, %c0_36] : memref<2x1xf32, #tpu.memory_space<vmem>>, vector<2x1xf32>
      %87 = arith.subf %85, %86 : vector<2x1xf32>
      %88 = math.absf %87 : vector<2x1xf32>
      %89 = vector.shape_cast %88 : vector<2x1xf32> to vector<1x2x1xf32>
      %cst_37 = arith.constant dense<0.000000e+00> : vector<1xf32>
      %90 = vector.multi_reduction <add>, %89, %cst_37 [1, 2] : vector<1x2x1xf32> to vector<1xf32>
      %91 = vector.shape_cast %90 : vector<1xf32> to vector<1x1x1xf32>
      %92 = vector.extract %91[0, 0, 0] : f32 from vector<1x1x1xf32>
      %c0_38 = arith.constant 0 : index
      %c0_39 = arith.constant 0 : index
      %c0_40 = arith.constant 0 : index
      %93 = vector.load %arg14[%c0_38, %c0_39, %c0_40] : memref<1x1x128xf32, #tpu.memory_space<vmem>>, vector<1x1x128xf32>
      %94 = vector.shape_cast %93 : vector<1x1x128xf32> to vector<1x128xf32>
      %c1_i32_41 = arith.constant 1 : i32
      %95 = vector.broadcast %c1_i32_41 : i32 to vector<1x128xi32>
      %96 = arith.cmpi eq, %43, %95 : vector<1x128xi32>
      %cst_42 = arith.constant 0.000000e+00 : f32
      %97 = vector.broadcast %77 : f32 to vector<1x128xf32>
      %98 = vector.broadcast %cst_42 : f32 to vector<1x128xf32>
      %99 = arith.select %96, %97, %98 : vector<1x128xi1>, vector<1x128xf32>
      %c2_i32 = arith.constant 2 : i32
      %100 = vector.broadcast %c2_i32 : i32 to vector<1x128xi32>
      %101 = arith.cmpi eq, %43, %100 : vector<1x128xi32>
      %cst_43 = arith.constant 0.000000e+00 : f32
      %102 = vector.broadcast %92 : f32 to vector<1x128xf32>
      %103 = vector.broadcast %cst_43 : f32 to vector<1x128xf32>
      %104 = arith.select %101, %102, %103 : vector<1x128xi1>, vector<1x128xf32>
      %105 = arith.addf %99, %104 : vector<1x128xf32>
      %106 = arith.addf %94, %105 : vector<1x128xf32>
      %c0_44 = arith.constant 0 : index
      %c0_45 = arith.constant 0 : index
      %c0_46 = arith.constant 0 : index
      %107 = vector.load %arg14[%c0_44, %c0_45, %c0_46] : memref<1x1x128xf32, #tpu.memory_space<vmem>>, vector<1x1x128xf32>
      %108 = vector.shape_cast %107 : vector<1x1x128xf32> to vector<1x128xf32>
      %109 = vector.shape_cast %106 : vector<1x128xf32> to vector<1x1x128xf32>
      tpu.vector_store %arg14[%c0_44, %c0_45, %c0_46], %109 {strides = array<i32>} : memref<1x1x128xf32, #tpu.memory_space<vmem>>, vector<1x1x128xf32>,
    } else {
    }
    return
  }
  func.func @transform_0(%arg0: i32, %arg1: i32) -> (i32, i32) {
    %c1_i32 = arith.constant 1 : i32
    %0 = arith.muli %arg0, %c1_i32 : i32
    %1 = arith.addi %0, %arg1 : i32
    %c0_i32 = arith.constant 0 : i32
    %c0_i32_0 = arith.constant 0 : i32
    return %1, %c0_i32 : i32, i32
  }
  func.func @transform_1(%arg0: i32, %arg1: i32) -> (i32, i32) {
    %c0_i32 = arith.constant 0 : i32
    %c0_i32_0 = arith.constant 0 : i32
    %c0_i32_1 = arith.constant 0 : i32
    return %c0_i32, %c0_i32_0 : i32, i32
  }
  func.func @transform_2(%arg0: i32, %arg1: i32) -> (i32, i32) {
    %c0_i32 = arith.constant 0 : i32
    %c0_i32_0 = arith.constant 0 : i32
    %c0_i32_1 = arith.constant 0 : i32
    return %c0_i32, %c0_i32_0 : i32, i32
  }
  func.func @transform_3(%arg0: i32, %arg1: i32) -> (i32, i32) {
    %c0_i32 = arith.constant 0 : i32
    %c0_i32_0 = arith.constant 0 : i32
    return %arg0, %c0_i32 : i32, i32
  }
  func.func @transform_4(%arg0: i32, %arg1: i32) -> (i32, i32) {
    %c0_i32 = arith.constant 0 : i32
    %c0_i32_0 = arith.constant 0 : i32
    return %arg0, %c0_i32 : i32, i32
  }
  func.func @transform_5(%arg0: i32, %arg1: i32) -> (i32, i32) {
    %c0_i32 = arith.constant 0 : i32
    %c0_i32_0 = arith.constant 0 : i32
    return %arg0, %c0_i32 : i32, i32
  }
  func.func @transform_6(%arg0: i32, %arg1: i32) -> (i32, i32) {
    %c0_i32 = arith.constant 0 : i32
    %c0_i32_0 = arith.constant 0 : i32
    return %arg0, %c0_i32 : i32, i32
  }
  func.func @transform_7(%arg0: i32, %arg1: i32) -> (i32, i32, i32) {
    %c0_i32 = arith.constant 0 : i32
    %c0_i32_0 = arith.constant 0 : i32
    %c0_i32_1 = arith.constant 0 : i32
    %c0_i32_2 = arith.constant 0 : i32
    return %c0_i32, %c0_i32_0, %c0_i32_1 : i32, i32, i32
  }
  func.func @transform_8(%arg0: i32, %arg1: i32) -> (i32, i32) {
    %c0_i32 = arith.constant 0 : i32
    %c0_i32_0 = arith.constant 0 : i32
    %c0_i32_1 = arith.constant 0 : i32
    return %c0_i32, %c0_i32_0 : i32, i32
  }
  func.func @transform_9(%arg0: i32, %arg1: i32) -> (i32, i32) {
    %c0_i32 = arith.constant 0 : i32
    %c0_i32_0 = arith.constant 0 : i32
    %c0_i32_1 = arith.constant 0 : i32
    return %c0_i32, %c0_i32_0 : i32, i32
  }
  func.func @transform_10(%arg0: i32, %arg1: i32) -> (i32, i32, i32) {
    %c0_i32 = arith.constant 0 : i32
    %c0_i32_0 = arith.constant 0 : i32
    %c0_i32_1 = arith.constant 0 : i32
    %c0_i32_2 = arith.constant 0 : i32
    return %c0_i32, %c0_i32_0, %c0_i32_1 : i32, i32, i32
  }
  func.func @transform_11(%arg0: i32, %arg1: i32) -> i32 {
    %c0_i32 = arith.constant 0 : i32
    %c0_i32_0 = arith.constant 0 : i32
    return %c0_i32 : i32
  }
  func.func @transform_12(%arg0: i32, %arg1: i32) -> (i32, i32, i32) {
    %c0_i32 = arith.constant 0 : i32
    %c0_i32_0 = arith.constant 0 : i32
    %c0_i32_1 = arith.constant 0 : i32
    return %arg0, %c0_i32, %c0_i32_0 : i32, i32, i32
  }
}

</mosaic_0001>

<bundles_post_ra>
// kernel: tpu_custom_call.1
= control target key start
LH: loop header
LB: loop body
LE: loop exit
PB: predicated region body
PF: predicated region fallthrough
CT: control target
= control target key end

     0   :  { %s1937_s0 = inlined_call_operand.vmem [shape: f32[16,128], index: 0, kind: input, shape index: {}]   ;;  %s1938_s1 = inlined_call_operand.vmem [shape: f32[1,32], index: 1, kind: input, shape index: {}]   ;;  %s1939_s2 = inlined_call_operand.vmem [shape: f32[8,128], index: 2, kind: input, shape index: {}]   ;;  %s1940_s3 = inlined_call_operand.vmem [shape: f32[64,32], index: 3, kind: input, shape index: {}]   ;;  %s1941_s4 = inlined_call_operand.vmem [shape: s32[64,1], index: 4, kind: input, shape index: {}]   ;;  %s1942_s5 = inlined_call_operand.vmem [shape: f32[32,32], index: 5, kind: input, shape index: {}]   ;;  %s1943_s6 = inlined_call_operand.vmem [shape: s32[32,1], index: 6, kind: input, shape index: {}]   ;;  %s1944_s7 = inlined_call_operand.vmem [shape: f32[2,8,4], index: 7, kind: input, shape index: {}]   ;;  %s1945_s8 = inlined_call_operand.vmem [shape: f32[2,1], index: 8, kind: input, shape index: {}]   ;;  %s1946_s9 = inlined_call_operand.vmem [shape: f32[2,128], index: 9, kind: input, shape index: {}]   ;;  %s1947_s10 = inlined_call_operand.vmem [shape: f32[3,2,128], index: 10, kind: input, shape index: {}]   ;;  %s1948_s11 = inlined_call_operand.<no memory space> [shape: f32[1], index: 11, kind: input, shape index: {}]   ;;  %s1949_s12 = inlined_call_operand.hbm [shape: f32[2,1,128], index: 12, kind: output, shape index: {}]  }
   0x1   :  { %1953 = sst [smem:[#allocation7_spill]] %s1937_s0 }
   0x2   :  { %1954 = sst [smem:[#allocation8_spill]] %s1938_s1 }
   0x3   :  { %17 = sst [smem:[#allocation3]] %s1948_s11 }
   0x4   :  { %18 = vsyncpa [#allocation5], 0 }
   0x5   :  { %20 = vsyncpa [#allocation5 + $0x1], 0  ;;  %s1619_s23 = smov 0   ;;  %s1621_s24 = smov 0  }
   0x6   :  { %s1623_s25 = smov 0   ;;  %s1625_s26 = smov 0  }
   0x7   :  { %s1627_s27 = smov 0   ;;  %s1629_s28 = smov 0  }
   0x8 LB: > { %s1296_s11 = sadd.s32 4294967295, %s1543_s28   ;;  %s1297_s29 = sadd.s32 4294967294, %s1543_s28   ;;  %s1543_s28 = sphi %s1629_s28, %s26_s28   ;;  %s1539_s27 = sphi %s1627_s27, %s1970_s27   ;;  %s1535_s26 = sphi %s1625_s26, %s1969_s26   ;;  %s1531_s25 = sphi %s1623_s25, %s1968_s25   ;;  %s1527_s24 = sphi %s1621_s24, %s1967_s24   ;;  %s1523_s23 = sphi %s1619_s23, %s1966_s23  }
   0x9   : > { %s38_s30 = sadd.s32 1, %s1539_s27  ;;  %s324_s13 = sadd.s32 1, %s1531_s25 }
   0xa   : > { %p40_p0 = scmp.ge.s32.totalorder %s38_s30, 2  ;;  %p334_p1 = scmp.ne.s32.totalorder %s1531_s25, %s1527_s24 }
   0xb   : > { %p335_p2 = scmp.eq.s32.totalorder %s1296_s11, 1  ;;  %p340_p3 = scmp.ne.s32.totalorder %s1527_s24, %s1523_s23 }
   0xc   : > { %s1972_s30 = smov (%p40_p0, %s38_s30), 0  ;;  %p341_p5 = scmp.eq.s32.totalorder %s1297_s29, 1 }
   0xd   : > { %p1659_p4 = por %p335_p2, %p334_p1  ;;  %s321_s15 = ssub.s32 %s1539_s27, %s1972_s30 }
   0xe   : > { %p1300_p6 = scmp.ge.s32.totalorder %s1543_s28, 1  ;;  %p322_p7 = scmp.eq.s32.totalorder %s321_s15, 0 }
   0xf   : > { %p1666_p8 = por %p341_p5, %p340_p3  ;;  %p425_p9 = scmp.lt.s32.totalorder %s1543_s28, 3 }
  0x10   : > { %s1672_s17 = scalar_select %p322_p7, %s1531_s25, %s324_s13  }
  0x11   : > { %p426_p10 = pnand %p1300_p6, %p425_p9 }
  0x12   : > { %s1302_s18 = sshll.u32 (!%p426_p10), %s1535_s26, 2  ;;  %s1306_s19 = sshll.u32 (!%p426_p10), %s1535_s26, 1  ;;  %v550_v0 = vlaneseq (!%p426_p10)  ;;  %v1545_v1 = vmov (!%p426_p10), 0   ;;  %vm583_vm0 = vcmask (!%p426_p10), 261120  }
  0x13   : > { %429 = sbr.rel (%p426_p10) target bundleno = 1590 (0x636), region = 68  ;;  %p493_p11 = scmp.lt.s32.totalorder (!%p426_p10), %s1302_s18, 7  ;;  %1418 = vset.pattern.permute.xlu1 (!%p426_p10), %v1545_v1  ;;  %1417 = vset.pattern.permute.xlu0 (!%p426_p10), %v1545_v1 }
  0x14   : > { %p505_p12 = scmp.lt.s32.totalorder (!%p426_p10), %s1306_s19, 3  ;;  %v1677_v2 = vshrl.u32 (!%p426_p10), %v550_v0, 7  ;;  %s1950_s20 = sshll.u32 (!%p426_p10), %s1535_s26, 4  ;;  %v1771_v53 = vand.u32 (!%p426_p10), 127, %v550_v0 }
  0x15   : > { %v694_v3 = vstv (!%p426_p10), %s1950_s20  ;;  %p487_p13 = scmp.lt.s32.totalorder (!%p426_p10), %s1535_s26, 1  ;;  %s1962_s0 = sld [smem:[#allocation7_spill]] (!%p426_p10) }
  0x16   : > { %v1685_v4 = vadd.s32 (!%p426_p10), 8, %v1677_v2  ;;  %v695_v5 = vadd.s32 (!%p426_p10), %v694_v3, %v1677_v2  ;;  %p803_p0 = scmp.eq.s32.totalorder (!%p426_p10), %s1535_s26, 0 }
  0x18   : > { %v696_v6 = vadd.s32 (!%p426_p10), %v694_v3, %v1685_v4  ;;  %vm697_vm1 = vcmp.lt.s32.totalorder (!%p426_p10), %v695_v5, 32 }
  0x1a   : > { %s1974_s18 = smov (!%p493_p11, %s1302_s18), 7  ;;  %s1976_s19 = smov (!%p505_p12, %s1306_s19), 3  ;;  %vm698_vm2 = vcmp.lt.s32.totalorder %v696_v6, 32 }
  0x1b   : > { %s1951_s21 = sshll.u32 %s1974_s18, 3  ;;  %s1307_s13 = sshll.u32 %s1976_s19, 3 }
  0x1c   : > { %s496_s29 = scalar_lea.vmem %s1940_s3, %s1951_s21  ;;  %s508_s19 = scalar_lea.vmem %s1942_s5, %s1307_s13 }
  0x1d   : > { %v1695_v7 = vld [vmem:[%s496_s29 + $0x10] sm:$0xff]  ;;  %v1697_v8 = vld [vmem:[%s496_s29] sm:$0xff]  ;;  %v1699_v9 = vld [vmem:[%s496_s29 + $0x18] sm:$0xff]  ;;  %s514_s21 = scalar_lea.vmem %s1943_s6, %s1307_s13  ;;  %s1961_s20 = sshll.u32 %s1974_s18, 3 }
  0x1e   : > { %v590_v10 = vsel %vm583_vm0, %v1695_v7, -inf  ;;  %v584_v11 = vsel %vm583_vm0, %v1697_v8, -inf  ;;  %v1705_v12 = vld [vmem:[%s496_s29 + $0x8] sm:$0xff]  ;;  %v593_v13 = vsel %vm583_vm0, %v1699_v9, -inf  ;;  %v691_v15 = vld [vmem:[%s514_s21] sm:$0xff]  ;;  %s502_s13 = scalar_lea.vmem %s1941_s4, %s1961_s20  ;;  %s1310_s20 = sshll.u32 %s1535_s26, 5 }
  0x1f   : > { %591 = vmax.xlane.f32.xlu1 %v590_v10  ;;  %585 = vmax.xlane.f32.xlu0 %v584_v11  ;;  %v587_v14 = vsel %vm583_vm0, %v1705_v12, -inf  ;;  %v692_v16 = vld [vmem:[%s514_s21 + $0x8] sm:$0xff]  ;;  %v1719_v18 = vld [vmem:[%s508_s19] sm:$0xff]  ;;  %vm699_vm3 = vcmp.ne.s32.totalorder %v691_v15, 0  ;;  %v581_v24 = vld [vmem:[%s502_s13 + $0x10] sm:$0xff]  ;;  %s488_s18 = scalar_select %p487_p13, %s1535_s26, 1 }
  0x20   : > { %v1717_v17 = vld [vmem:[%s508_s19 + $0x8] sm:$0xff]  ;;  %vm700_vm4 = vcmp.ne.s32.totalorder %v692_v16, 0  ;;  %vm1721_vm5 = vmand %vm697_vm1, %vm699_vm3  ;;  %v707_v22 = vsel %vm583_vm0, %v1719_v18, -inf  ;;  %v579_v25 = vld [vmem:[%s502_s13] sm:$0xff]  ;;  %vm777_vm3 = vcmask 1040384  }
  0x21   : > { %vm1725_vm6 = vmand %vm698_vm2, %vm700_vm4  ;;  %v710_v21 = vsel %vm583_vm0, %v1717_v17, -inf  ;;  %v580_v23 = vld [vmem:[%s502_s13 + $0x8] sm:$0xff]  ;;  %v582_v26 = vld [vmem:[%s502_s13 + $0x18] sm:$0xff]  ;;  %s1301_s15 = sshll.u32 %s488_s18, 3  ;;  %vm672_vm2 = vcmask 7168   ;;  %vm790_vm4 = vcmp.eq.s32.totalorder %v1771_v53, 5 }
  0x22   : > { %s490_s11 = scalar_lea.vmem %s1962_s0, %s1301_s15  ;;  %s1952_s15 = sand.u32 1, %s1527_s24  }
  0x23   : > { %594 = vmax.xlane.f32.xlu1 %v593_v13  ;;  %588 = vmax.xlane.f32.xlu0 %v587_v14  ;;  %v1763_v41 = vld [vmem:[%s490_s11] sm:$0xff]  ;;  %s1831_s22 = scalar_lea.vmem [#allocation4], %s1952_s15  ;;  %s901_s11 = sld [smem:[#allocation3]] (%p803_p0) }
  0x24   : > { %v522_v44 = vand.u32 2147483647, %v1763_v41  ;;  %vm532_vm13 = vcmp.ge.f32.partialorder %v1763_v41, 0.0 }
  0x26   : > { %v523_v47 = vsub.f32 0.0, %v522_v44 }
  0x27   : > { %711 = vmax.xlane.f32.xlu1 %v710_v21  ;;  %708 = vmax.xlane.f32.xlu0 %v707_v22 }
  0x28   : > { %v524_v49 = vmul.f32 1.442695, %v523_v47 }
  0x38   : > { %636 = vperm.xlu1 %1418, %v580_v23  }
  0x3c   : > { %639 = vperm.xlu1 %1418, %v581_v24  }
  0x3d   : > { %633 = vperm.xlu0 %1417, %v579_v25  }
  0x40   : > { %642 = vperm.xlu1 %1418, %v582_v26  }
  0x44   : > { %732 = vperm.xlu1 %1418, %v691_v15  }
  0x48   : > { %735 = vperm.xlu1 %1418, %v692_v16  }
  0xac   : > { %v1738_v27 = vpop.xlane.xlu1 %591  ;;  %v1740_v28 = vpop.xlane.xlu0 %585 }
  0xad   : > { %v598_v29 = vsub.f32 %v1695_v7, %v1738_v27  ;;  %v596_v30 = vsub.f32 %v1697_v8, %v1740_v28 }
  0xaf   : > { %v604_v31 = vmul.f32 1.442695, %v598_v29  ;;  %v600_v32 = vmul.f32 1.442695, %v596_v30  ;;  %v526_v29 = vmax.f32 %v1763_v41, 0.0 }
  0xb0   : > { %v1747_v33 = vpop.xlane.xlu1 %594  ;;  %v1749_v34 = vpop.xlane.xlu0 %588 }
  0xb1   : > { %1419 = vpow2.f32 %v604_v31  ;;  %v599_v35 = vsub.f32 %v1699_v9, %v1747_v33  ;;  %v597_v36 = vsub.f32 %v1705_v12, %v1749_v34 }
  0xb2   : > { %1421 = vpow2.f32 %v600_v32 }
  0xb3   : > { %v606_v37 = vmul.f32 1.442695, %v599_v35  ;;  %v602_v38 = vmul.f32 1.442695, %v597_v36  ;;  %v562_v36 = vstv %s1310_s20 }
  0xb4   : > { %v1759_v39 = vpop.xlane.xlu1 %711  ;;  %v1761_v40 = vpop.xlane.xlu0 %708 }
  0xb5   : > { %1423 = vpow2.f32 %v606_v37  ;;  %v714_v42 = vsub.f32 %v1717_v17, %v1759_v39  ;;  %v713_v43 = vsub.f32 %v1719_v18, %v1761_v40  ;;  %v563_v37 = vadd.s32 %v562_v36, %v1677_v2 }
  0xb6   : > { %1425 = vpow2.f32 %v602_v38 }
  0xb7   : > { %v717_v45 = vmul.f32 1.442695, %v714_v42  ;;  %v715_v46 = vmul.f32 1.442695, %v713_v43  ;;  %vm567_vm14 = vcmp.lt.s32.totalorder %v563_v37, 64  ;;  %v560_v42 = vadd.s32 16, %v1677_v2 }
  0xb8   : > { %v637_v48 = vpop.permute.xlu1 %636  ;;  %v1546_v43 = vmov 0.0  }
  0xb9   : > { %1427 = vpow2.f32 %v717_v45  ;;  %vm645_vm8 = vcmp.eq.s32.totalorder %v1771_v53, %v637_v48  ;;  %520 = vst [vmem:[#allocation2] sm:$0x1] %v1546_v43  ;;  %v1311_v44 = vsel %vm567_vm14, 1.0, %v1546_v43  ;;  %v564_v45 = vadd.s32 %v562_v36, %v1685_v4 }
  0xba   : > { %1429 = vpow2.f32 %v715_v46  ;;  %v565_v46 = vadd.s32 %v562_v36, %v560_v42  ;;  %v561_v48 = vadd.s32 24, %v1677_v2  ;;  %v1317_v4 = vsel %vm1725_vm6, 1.0, %v1546_v43 }
  0xbb   : > { %v1420_v50 = vpop.eup %1419  ;;  %1431 = vpow2.f32 %v524_v49  ;;  %vm568_vm15 = vcmp.lt.s32.totalorder %v564_v45, 64  ;;  %vm794_vm6 = vcmp.eq.s32.totalorder %v1771_v53, 6  ;;  %vm1035_vm14 = vcmask (%p803_p0), 8192  }
  0xbc   : > { %v1422_v51 = vpop.eup %1421  ;;  %v640_v52 = vpop.permute.xlu1 %639  ;;  %v614_v57 = vsel %vm583_vm0, %v1420_v50, 0.0  ;;  %v1312_v49 = vsel %vm568_vm15, 1.0, %v1546_v43  ;;  %vm1020_vm15 = vcmask (%p803_p0), 1024  }
  0xbd   : > { %v608_v54 = vsel %vm583_vm0, %v1422_v51, 0.0  ;;  %v634_v55 = vpop.permute.xlu0 %633  ;;  %vm646_vm9 = vcmp.eq.s32.totalorder %v1771_v53, %v640_v52  ;;  %v566_v52 = vadd.s32 %v562_v36, %v561_v48 }
  0xbe   : > { %609 = vadd.xlane.f32.xlu1 %v608_v54  ;;  %vm644_vm7 = vcmp.eq.s32.totalorder %v1771_v53, %v634_v55  ;;  %v650_v13 = vsel %vm646_vm9, %v1695_v7, 0.0  ;;  %vm1548_vm9 = vmmov (%p803_p0), 0  }
  0xbf   : > { %v1424_v56 = vpop.eup %1423  ;;  %v648_v0 = vsel %vm644_vm7, %v1697_v8, 0.0  ;;  %v649_v8 = vsel %vm645_vm8, %v1705_v12, 0.0  ;;  %v658_v16 = vsel %vm583_vm0, %v650_v13, 0.0  ;;  %vm570_vm1 = vcmp.lt.s32.totalorder %v566_v52, 64 }
  0xc0   : > { %v1426_v58 = vpop.eup %1425  ;;  %v643_v59 = vpop.permute.xlu1 %642  ;;  %v617_v62 = vsel %vm583_vm0, %v1424_v56, 0.0  ;;  %v652_v11 = vsel %vm583_vm0, %v648_v0, 0.0  ;;  %v655_v15 = vsel %vm583_vm0, %v649_v8, 0.0  ;;  %v538_v55 = vld [vmem:[#allocation2] sm:$0x1]  ;;  %v1314_v56 = vsel %vm570_vm1, 1.0, %v1546_v43 }
  0xc1   : > { %v611_v60 = vsel %vm583_vm0, %v1426_v58, 0.0  ;;  %vm647_vm10 = vcmp.eq.s32.totalorder %v1771_v53, %v643_v59  ;;  %vm798_vm7 = vcmp.eq.s32.totalorder %v1771_v53, 7  ;;  %vm893_vm8 = vcmask (%p803_p0), 1041408  }
  0xc2   : > { %615 = vadd.xlane.f32.xlu1 %v614_v57  ;;  %612 = vadd.xlane.f32.xlu0 %v611_v60  ;;  %v651_v21 = vsel %vm647_vm10, %v1699_v9, 0.0  ;;  %v1316_v57 = vsel %vm1721_vm5, 1.0, %v1546_v43  ;;  %vm775_vm5 = vcmp.eq.s32.totalorder %v1771_v53, 0  ;;  %vm811_vm10 = vcmp.lt.s32.totalorder (%p803_p0), %v1771_v53, 8 }
  0xc3   : > { %v1428_v61 = vpop.eup %1427  ;;  %v661_v12 = vsel %vm583_vm0, %v651_v21, 0.0  ;;  %v763_v60 = vsel %vm672_vm2, %v1316_v57, 0.0  ;;  %vm1055_vm1 = vcmp.eq.s32.totalorder (%p803_p0), %v1771_v53, 4 }
  0xc4   : > { %v1430_v63 = vpop.eup %1429  ;;  %v733_v5 = vpop.permute.xlu1 %732  ;;  %v722_v10 = vsel %vm583_vm0, %v1428_v61, 0.0  ;;  %v764_v61 = vsel %vm672_vm2, %v1317_v4, 0.0 }
  0xc5   : > { %v1432_v1 = vpop.eup %1431  ;;  %v719_v3 = vsel %vm583_vm0, %v1430_v63, 0.0  ;;  %vm737_vm11 = vcmp.eq.s32.totalorder %v1771_v53, %v733_v5 }
  0xc6   : > { %618 = vadd.xlane.f32.xlu1 %v617_v62  ;;  %720 = vadd.xlane.f32.xlu0 %v719_v3  ;;  %v527_v6 = vadd.f32 1.0, %v1432_v1  ;;  %v739_v22 = vsel %vm737_vm11, %v1719_v18, 0.0  ;;  %v765_v62 = vadd.f32 %v764_v61, %v763_v60  ;;  %vm820_vm11 = vcmask (%p803_p0), 1043456  }
  0xc7   : > { %v741_v7 = vsel %vm583_vm0, %v739_v22, 0.0 }
  0xc8   : > { %1433 = vrcp.f32 %v527_v6  ;;  %v736_v14 = vpop.permute.xlu1 %735 }
  0xc9   : > { %1435 = vlog2.f32 %v527_v6  ;;  %vm738_vm12 = vcmp.eq.s32.totalorder %v1771_v53, %v736_v14 }
  0xca   : > { %723 = vadd.xlane.f32.xlu1 %v722_v10  ;;  %653 = vadd.xlane.f32.xlu0 %v652_v11  ;;  %v740_v24 = vsel %vm738_vm12, %v1717_v17, 0.0  ;;  %vm974_vm12 = vcmask (%p803_p0), 9216  }
  0xcb   : > { %v744_v9 = vsel %vm583_vm0, %v740_v24, 0.0  ;;  %vm569_vm0 = vcmp.lt.s32.totalorder %v565_v46, 64 }
  0xcc   : > { %v1313_v50 = vsel %vm569_vm0, 1.0, %v1546_v43  ;;  %vm1052_vm0 = vcmp.eq.s32.totalorder (%p803_p0), %v1771_v53, 3 }
  0xce   : > { %656 = vadd.xlane.f32.xlu1 %v655_v15  ;;  %659 = vadd.xlane.f32.xlu0 %v658_v16 }
  0xd2   : > { %v1434_v23 = vpop.eup %1433  ;;  %662 = vadd.xlane.f32.xlu1 %v661_v12  ;;  %742 = vadd.xlane.f32.xlu0 %v741_v7 }
  0xd3   : > { %v1436_v25 = vpop.eup %1435  ;;  %v533_v26 = vmul.f32 %v1434_v23, %v1432_v1 }
  0xd4   : > { %v529_v30 = vmul.f32 0.6931472, %v1436_v25 }
  0xd5   : > { %v534_v18 = vsel %vm532_vm13, %v1434_v23, %v533_v26  ;;  %vm991_vm13 = vcmp.eq.s32.totalorder (%p803_p0), %v1677_v2, %v1771_v53 }
  0xd6   : > { %745 = vadd.xlane.f32.xlu1 %v744_v9  ;;  %v530_v31 = vadd.f32 %v529_v30, %v526_v29  ;;  %v535_v32 = vmul.f32 %v534_v18, %v534_v18 }
  0xd8   : > { %v536_v35 = vmul.f32 %v535_v32, %v530_v31 }
  0xda   : > { %v537_v38 = vmul.f32 0.75, %v536_v35 }
  0xdc   : > { %v539_v17 = vrot.slane %v537_v38, 4 }
  0xde   : > { %v540_v41 = vadd.f32 %v539_v17, %v537_v38 }
  0xe0   : > { %v541_v47 = vrot.slane %v540_v41, 2 }
  0xe2   : > { %v542_v51 = vadd.f32 %v541_v47, %v540_v41 }
  0xe4   : > { %v543_v54 = vrot.slane %v542_v51, 1 }
  0xe6   : > { %v544_v58 = vadd.f32 %v543_v54, %v542_v51 }
  0xe8   : > { %v545_v59 = vadd.f32 %v544_v58, %v538_v55 }
  0xea   : > { %546 = vst [vmem:[#allocation2] sm:$0x1] %v545_v59 }
  0xf1   : > { %v776_v55 = vld [vmem:[#allocation2] sm:$0x1] }
 0x14b   : > { %v610_v63 = vpop.xlane.xlu1 %609 }
 0x14c   : > { %1437 = vlog2.f32 %v610_v63 }
 0x14f   : > { %v616_v0 = vpop.xlane.xlu1 %615  ;;  %v613_v1 = vpop.xlane.xlu0 %612 }
 0x150   : > { %1439 = vlog2.f32 %v616_v0 }
 0x151   : > { %1441 = vlog2.f32 %v613_v1 }
 0x153   : > { %v619_v19 = vpop.xlane.xlu1 %618  ;;  %v721_v3 = vpop.xlane.xlu0 %720 }
 0x154   : > { %1443 = vlog2.f32 %v619_v19 }
 0x155   : > { %1445 = vlog2.f32 %v721_v3 }
 0x156   : > { %v1438_v20 = vpop.eup %1437 }
 0x157   : > { %v621_v5 = vmul.f32 0.6931472, %v1438_v20  ;;  %v724_v6 = vpop.xlane.xlu1 %723  ;;  %v654_v10 = vpop.xlane.xlu0 %653 }
 0x158   : > { %1447 = vlog2.f32 %v724_v6 }
 0x159   : > { %v628_v11 = vadd.f32 %v621_v5, %v1740_v28 }
 0x15a   : > { %v1440_v8 = vpop.eup %1439 }
 0x15b   : > { %v1442_v13 = vpop.eup %1441  ;;  %v625_v14 = vmul.f32 0.6931472, %v1440_v8  ;;  %v657_v15 = vpop.xlane.xlu1 %656  ;;  %v664_v21 = vsub.f32 %v628_v11, %v654_v10 }
 0x15c   : > { %v623_v16 = vmul.f32 0.6931472, %v1442_v13  ;;  %v660_v12 = vpop.xlane.xlu0 %659 }
 0x15d   : > { %v630_v22 = vadd.f32 %v625_v14, %v1738_v27  ;;  %v668_v30 = vmul.f32 %v1311_v44, %v664_v21 }
 0x15e   : > { %v1444_v7 = vpop.eup %1443  ;;  %v629_v23 = vadd.f32 %v623_v16, %v1749_v34 }
 0x15f   : > { %v1446_v24 = vpop.eup %1445  ;;  %v627_v25 = vmul.f32 0.6931472, %v1444_v7  ;;  %v666_v26 = vsub.f32 %v630_v22, %v660_v12  ;;  %v663_v18 = vpop.xlane.xlu1 %662  ;;  %v673_v17 = vsel %vm672_vm2, %v668_v30, 0.0 }
 0x160   : > { %v726_v29 = vmul.f32 0.6931472, %v1446_v24  ;;  %v665_v9 = vsub.f32 %v629_v23, %v657_v15  ;;  %v743_v38 = vpop.xlane.xlu0 %742 }
 0x161   : > { %v631_v28 = vadd.f32 %v627_v25, %v1747_v33  ;;  %v670_v35 = vmul.f32 %v1313_v50, %v666_v26 }
 0x162   : > { %v1448_v31 = vpop.eup %1447  ;;  %v669_v32 = vmul.f32 %v1312_v49, %v665_v9  ;;  %v729_v36 = vadd.f32 %v726_v29, %v1761_v40 }
 0x163   : > { %v728_v37 = vmul.f32 0.6931472, %v1448_v31  ;;  %v667_v27 = vsub.f32 %v631_v28, %v663_v18  ;;  %v746_v45 = vpop.xlane.xlu1 %745  ;;  %v676_v33 = vsel %vm672_vm2, %v670_v35, 0.0 }
 0x164   : > { %v674_v34 = vsel %vm672_vm2, %v669_v32, 0.0  ;;  %v747_v42 = vsub.f32 %v729_v36, %v743_v38  ;;  %v890_v36 = vld [vmem:[%s1947_s10] sm:$0x3] (%p803_p0)  ;;  %v892_v38 = vld [vmem:[%s1947_s10 + $0x4] sm:$0x3] (%p803_p0) }
 0x165   : > { %v671_v43 = vmul.f32 %v1314_v56, %v667_v27  ;;  %v730_v44 = vadd.f32 %v728_v37, %v1759_v39  ;;  %v675_v41 = vadd.f32 %v674_v34, %v673_v17  ;;  %v778_v39 = vsel %vm777_vm3, %v776_v55, 0.0  ;;  %v891_v37 = vld [vmem:[%s1947_s10 + $0x2] sm:$0x3] (%p803_p0) }
 0x166   : > { %v749_v46 = vmul.f32 %v1316_v57, %v747_v42  ;;  %v1547_v27 = vmov (%p803_p0), 0.0   ;;  %v894_v17 = vsel (%p803_p0), %vm893_vm8, %v890_v36, 0.0  ;;  %v895_v34 = vsel (%p803_p0), %vm893_vm8, %v891_v37, 0.0  ;;  %v810_v42 = vld [vmem:[%s1939_s2] sm:$0xff] (%p803_p0) }
 0x167   : > { %v748_v47 = vsub.f32 %v730_v44, %v746_v45  ;;  %v677_v48 = vadd.f32 %v676_v33, %v675_v41  ;;  %v678_v40 = vsel %vm672_vm2, %v671_v43, 0.0  ;;  %1330 = vmatprep.subr.mxu0 (%p803_p0), %v1547_v27  ;;  %v896_v43 = vadd.f32 (%p803_p0), %v895_v34, %v894_v17  ;;  %1332 = vmatprep.mubr.msk.f32.mxu0 (%p803_p0), %vm1548_vm9, %v1547_v27 }
 0x168   : > { %v751_v51 = vsel %vm672_vm2, %v749_v46, 0.0  ;;  %v897_v44 = vsel (%p803_p0), %vm893_vm8, %v892_v38, 0.0  ;;  %v815_v41 = vrot.slane (%p803_p0), %v810_v42, 4  ;;  %v831_v45 = vmul.f32 (%p803_p0), 0.5, %v810_v42 }
 0x169   : > { %v750_v49 = vmul.f32 %v1317_v4, %v748_v47  ;;  %v679_v50 = vadd.f32 %v678_v40, %v677_v48  ;;  %v898_v33 = vadd.f32 (%p803_p0), %v897_v44, %v896_v43  ;;  %v1319_v47 = vsel (%p803_p0), %vm811_vm10, 1.0, %v1547_v27 }
 0x16a   : > { %v817_v46 = vsub.f32 (%p803_p0), %v810_v42, %v815_v41  ;;  %v833_v48 = vrot.slane (%p803_p0), %v831_v45, 2 }
 0x16b   : > { %680 = vadd.xlane.f32.xlu0 %v679_v50  ;;  %v752_v52 = vsel %vm672_vm2, %v750_v49, 0.0  ;;  %v900_v40 = vmul.f32 (%p803_p0), 0.33333334, %v898_v33 }
 0x16c   : > { %v753_v54 = vadd.f32 %v752_v52, %v751_v51  ;;  %v818_v49 = vand.u32 (%p803_p0), 2147483647, %v817_v46  ;;  %v835_v50 = vsub.f32 (%p803_p0), %v810_v42, %v833_v48  ;;  %v836_v51 = vadd.f32 (%p803_p0), %v833_v48, %v810_v42  ;;  %v889_v52 = vld [vmem:[%s1946_s9] sm:$0x3] (%p803_p0) }
 0x16d   : > { %1331 = vmatpush3.xpose.msra.mxu0 (%p803_p0), %v900_v40 }
 0x16e   : > { %754 = vadd.xlane.f32.xlu1 %v753_v54  ;;  %v819_v54 = vmul.f32 (%p803_p0), %v1319_v47, %v818_v49  ;;  %v837_v55 = vsub.f32 (%p803_p0), %v836_v51, %v835_v50 }
 0x16f   : > { %766 = vadd.xlane.f32.xlu0 %v765_v62 }
 0x170   : > { %1333 = vmatmul.mubr.f32.vlgmr.msra.gmra.mrb[0].mxu0 (%p803_p0), %v889_v52 }
 0x172   : > { %779 = vadd.xlane.f32.xlu1 %v778_v39  ;;  %v843_v39 = vrot.slane (%p803_p0), %v836_v51, 4 }
 0x1f8   : > { %v681_v56 = vpop.xlane.xlu0 %680 }
 0x1f9   : > { %v682_v57 = vrot.slane %v681_v56, 4 }
 0x1fb   : > { %v683_v58 = vadd.f32 %v682_v57, %v681_v56  ;;  %v755_v59 = vpop.xlane.xlu1 %754  ;;  %v847_v56 = vrot.slane (%p803_p0), %v835_v50, 4  ;;  %v821_v57 = vsel (%p803_p0), %vm820_vm11, %v819_v54, 0.0 }
 0x1fc   : > { %v756_v4 = vrot.slane %v755_v59, 4  ;;  %v767_v60 = vpop.xlane.xlu0 %766  ;;  %822 = vadd.xlane.f32.xlu0 (%p803_p0), %v821_v57 }
 0x1fd   : > { %v684_v61 = vrot.slane %v683_v58, 2  ;;  %v768_v63 = vrot.slane %v767_v60, 4 }
 0x1fe   : > { %v757_v0 = vadd.f32 %v756_v4, %v755_v59  ;;  %v845_v59 = vmin.f32 (%p803_p0), %v836_v51, %v843_v39  ;;  %v849_v4 = vmax.f32 (%p803_p0), %v835_v50, %v847_v56 }
 0x1ff   : > { %v769_v1 = vadd.f32 %v768_v63, %v767_v60  ;;  %v780_v19 = vpop.xlane.xlu1 %779  ;;  %v685_v3 = vadd.f32 %v684_v61, %v683_v58  ;;  %v839_v58 = vrot.slane (%p803_p0), %v837_v55, 1  ;;  %v864_v60 = vmax.f32 (%p803_p0), %v836_v51, %v843_v39 }
 0x200   : > { %v758_v20 = vrot.slane %v757_v0, 2  ;;  %v781_v5 = vrot.slane %v780_v19, 4  ;;  %v865_v61 = vmin.f32 (%p803_p0), %v835_v50, %v847_v56 }
 0x201   : > { %v770_v6 = vrot.slane %v769_v1, 2  ;;  %v686_v62 = vrot.slane %v685_v3, 1  ;;  %v841_v63 = vmul.f32 (%p803_p0), %v839_v58, %v837_v55 }
 0x202   : > { %v782_v10 = vadd.f32 %v781_v5, %v780_v19  ;;  %v759_v11 = vadd.f32 %v758_v20, %v757_v0  ;;  %v850_v0 = vsub.f32 (%p803_p0), %v845_v59, %v849_v4 }
 0x203   : > { %v771_v8 = vadd.f32 %v770_v6, %v769_v1  ;;  %v687_v13 = vadd.f32 %v686_v62, %v685_v3  ;;  %v866_v1 = vsub.f32 (%p803_p0), %v864_v60, %v865_v61  ;;  %v857_v3 = vrot.slane (%p803_p0), %v841_v63, 4 }
 0x204   : > { %v783_v14 = vrot.slane %v782_v10, 2  ;;  %v760_v15 = vrot.slane %v759_v11, 1  ;;  %v851_v19 = vmax.f32 (%p803_p0), %v850_v0, 0.0 }
 0x205   : > { %1335 = vpush %v687_v13  ;;  %v772_v16 = vrot.slane %v771_v8, 1  ;;  %v868_v20 = vrot.slane (%p803_p0), %v866_v1, 1  ;;  %v859_v6 = vadd.f32 (%p803_p0), %v857_v3, %v841_v63 }
 0x206   : > { %v784_v21 = vadd.f32 %v783_v14, %v782_v10  ;;  %v761_v22 = vadd.f32 %v760_v15, %v759_v11  ;;  %v853_v5 = vrot.slane (%p803_p0), %v851_v19, 1 }
 0x207   : > { %v773_v12 = vadd.f32 %v772_v16, %v771_v8  ;;  %v870_v62 = vmul.f32 (%p803_p0), %v868_v20, %v866_v1 }
 0x208   : > { %1337 = vpush %v761_v22  ;;  %v785_v7 = vrot.slane %v784_v21, 1  ;;  %v855_v10 = vmul.f32 (%p803_p0), %v853_v5, %v851_v19 }
 0x209   : > { %1339 = vpush %v773_v12  ;;  %v872_v11 = vadd.f32 (%p803_p0), 1e-07, %v870_v62 }
 0x20a   : > { %v786_v23 = vadd.f32 %v785_v7, %v784_v21  ;;  %v860_v8 = vsub.f32 (%p803_p0), %v859_v6, %v855_v10 }
 0x20b   : > { %1449 = vrcp.f32 (%p803_p0), %v872_v11 }
 0x20c   : > { %1341 = vpush %v786_v23  ;;  %v861_v13 = vadd.f32 (%p803_p0), 1e-07, %v860_v8  ;;  %v871_v14 = vsub.f32 (%p803_p0), %v870_v62, %v860_v8 }
 0x20e   : > { %1451 = vrcp.f32 (%p803_p0), %v861_v13 }
 0x215   : > { %v1450_v15 = vpop.eup (%p803_p0), %1449 }
 0x216   : > { %v874_v16 = vmul.f32 (%p803_p0), %v1450_v15, %v871_v14 }
 0x218   : > { %v1452_v21 = vpop.eup (%p803_p0), %1451 }
 0x219   : > { %v863_v22 = vmul.f32 (%p803_p0), %v1452_v21, %v855_v10 }
 0x21b   : > { %v875_v12 = vsub.f32 (%p803_p0), %v863_v22, %v874_v16 }
 0x21d   : > { %v876_v7 = vsub.f32 (%p803_p0), 1.0, %v875_v12 }
 0x21f   : > { %v877_v23 = vmul.f32 (%p803_p0), %v1319_v47, %v876_v7 }
 0x236   : > { %s1336_s21 = spop %1335 }
 0x237   : > { %v791_v24 = vstv %s1336_s21 }
 0x238   : > { %v792_v29 = vsel %vm790_vm4, %v791_v24, 0.0  ;;  %v879_v24 = vsel (%p803_p0), %vm777_vm3, %v877_v23, 0.0  ;;  %vm1059_vm3 = vcmp.eq.s32.totalorder (%p803_p0), %v1771_v53, 8 }
 0x239   : > { %s1338_s29 = spop %1337  ;;  %880 = vadd.xlane.f32.xlu0 (%p803_p0), %v879_v24 }
 0x23a   : > { %s1340_s13 = spop %1339  ;;  %v795_v25 = vstv %s1338_s29 }
 0x23b   : > { %v799_v9 = vstv %s1340_s13  ;;  %v796_v28 = vsel %vm794_vm6, %v795_v25, 0.0 }
 0x23c   : > { %v800_v32 = vsel %vm798_vm7, %v799_v9, 0.0 }
 0x23d   : > { %s1342_s18 = spop %1341 }
 0x23e   : > { %v788_v26 = vstv %s1342_s18 }
 0x23f   : > { %v789_v30 = vsel %vm775_vm5, %v788_v26, 0.0  ;;  %v972_v26 = vstv (%p803_p0), %s901_s11 }
 0x240   : > { %v793_v18 = vadd.f32 %v792_v29, %v789_v30  ;;  %807 = sbr.rel (!%p803_p0) target bundleno = 1184 (0x4a0), region = 80 }
 0x242   : > { %v797_v31 = vadd.f32 %v796_v28, %v793_v18 }
 0x243   : > { %v968_v30 = vpop.f32.mrb[0].mxu0 (%p803_p0) }
 0x244   : > { %v801_v35 = vadd.f32 %v800_v32, %v797_v31  ;;  %v973_v9 = vmul.f32 (%p803_p0), %v972_v26, %v968_v30  ;;  %v1334_v18 = vpop.f32.mrb[1].mxu0 (%p803_p0) }
 0x246   : > { %802 = vst [vmem:[%s1831_s22] sm:$0x1] %v801_v35  ;;  %v975_v32 = vsel (%p803_p0), %vm974_vm12, %v973_v9, -inf  ;;  %v992_v35 = vsel (%p803_p0), %vm991_vm13, %v973_v9, 0.0 }
 0x247   : > { %976 = vmax.xlane.f32.xlu1 %v975_v32  ;;  %v993_v36 = vsel %vm974_vm12, %v992_v35, 0.0 }
 0x248   : > { %994 = vadd.xlane.f32.xlu0 %v993_v36  ;;  %v996_v59 = vrot.slane %v993_v36, 4 }
 0x24a   : > { %v997_v61 = vadd.f32 %v996_v59, %v993_v36 }
 0x24c   : > { %v998_v0 = vrot.slane %v997_v61, 2 }
 0x24e   : > { %v999_v1 = vadd.f32 %v998_v0, %v997_v61 }
 0x250   : > { %v1000_v19 = vrot.slane %v999_v1, 1 }
 0x252   : > { %v1001_v5 = vadd.f32 %v1000_v19, %v999_v1 }
 0x289   : > { %v823_v25 = vpop.xlane.xlu0 %822 }
 0x28a   : > { %v824_v28 = vrot.slane %v823_v25, 4 }
 0x28c   : > { %v825_v37 = vadd.f32 %v824_v28, %v823_v25 }
 0x28e   : > { %v826_v38 = vrot.slane %v825_v37, 2 }
 0x290   : > { %v827_v34 = vadd.f32 %v826_v38, %v825_v37 }
 0x292   : > { %v828_v43 = vrot.slane %v827_v34, 1 }
 0x294   : > { %v829_v2 = vadd.f32 %v828_v43, %v827_v34 }
 0x296   : > { %1343 = vpush %v829_v2 }
 0x2c6   : > { %v881_v29 = vpop.xlane.xlu0 %880 }
 0x2c7   : > { %v882_v31 = vrot.slane %v881_v29, 4  ;;  %s1857_s20 = spop %1343 }
 0x2c8   : > { %v1053_v36 = vstv %s1857_s20 }
 0x2c9   : > { %v883_v27 = vadd.f32 %v882_v31, %v881_v29 }
 0x2cb   : > { %v884_v17 = vrot.slane %v883_v27, 2 }
 0x2cd   : > { %v885_v42 = vadd.f32 %v884_v17, %v883_v27  ;;  %v1054_v27 = vsel %vm1052_vm0, %v1053_v36, 0.0 }
 0x2cf   : > { %v886_v44 = vrot.slane %v885_v42, 1 }
 0x2d1   : > { %v887_v41 = vadd.f32 %v886_v44, %v885_v42  ;;  %v1051_v42 = vld [vmem:[%s1831_s22] sm:$0x1] }
 0x2d3   : > { %1345 = vpush %v887_v41 }
 0x2d4   : > { %v977_v45 = vpop.xlane.xlu1 %976 }
 0x2d5   : > { %v978_v33 = vrot.slane %v977_v45, 4  ;;  %v995_v16 = vpop.xlane.xlu0 %994 }
 0x2d7   : > { %v979_v46 = vmax.f32 %v977_v45, %v978_v33 }
 0x2d9   : > { %v980_v47 = vrot.slane %v979_v46, 2 }
 0x2db   : > { %v981_v48 = vmax.f32 %v979_v46, %v980_v47 }
 0x2dd   : > { %v982_v40 = vrot.slane %v981_v48, 1 }
 0x2df   : > { %v983_v49 = vmax.f32 %v981_v48, %v982_v40 }
 0x2e1   : > { %1347 = vpush %v983_v49 }
 0x304   : > { %s1859_s21 = spop %1345 }
 0x305   : > { %v1056_v37 = vstv %s1859_s21 }
 0x306   : > { %v1057_v38 = vsel %vm1055_vm1, %v1056_v37, 0.0 }
 0x307   : > { %v1058_v17 = vadd.f32 %v1057_v38, %v1054_v27 }
 0x312   : > { %s1348_s29 = spop %1347 }
 0x313   : > { %v985_v50 = vstv %s1348_s29 }
 0x314   : > { %v986_v51 = vsub.f32 %v973_v9, %v985_v50 }
 0x316   : > { %v987_v52 = vmul.f32 1.442695, %v986_v51 }
 0x318   : > { %1453 = vpow2.f32 %v987_v52 }
 0x322   : > { %v1454_v54 = vpop.eup %1453 }
 0x323   : > { %v1002_v55 = vsel %vm974_vm12, %v1454_v54, 0.0 }
 0x324   : > { %1003 = vadd.xlane.f32.xlu1 %v1002_v55  ;;  %v1009_v39 = vrot.slane %v1002_v55, 4 }
 0x326   : > { %v1010_v56 = vadd.f32 %v1009_v39, %v1002_v55 }
 0x328   : > { %v1011_v57 = vrot.slane %v1010_v56, 2 }
 0x32a   : > { %v1012_v58 = vadd.f32 %v1011_v57, %v1010_v56 }
 0x32c   : > { %v1013_v4 = vrot.slane %v1012_v58, 1 }
 0x32e   : > { %v1014_v60 = vadd.f32 %v1013_v4, %v1012_v58 }
 0x330   : > { %v1015_v63 = vmax.f32 %v1014_v60, 1e-30 }
 0x332   : > { %1455 = vlog2.f32 %v1015_v63 }
 0x33c   : > { %v1456_v3 = vpop.eup %1455 }
 0x33d   : > { %v1017_v20 = vmul.f32 0.6931472, %v1456_v3 }
 0x33f   : > { %v1018_v6 = vadd.f32 %v1017_v20, %v985_v50 }
 0x341   : > { %v1034_v62 = vsub.f32 %v1018_v6, %v1001_v5 }
 0x343   : > { %v1036_v10 = vsel %vm1035_vm14, %v1034_v62, 0.0 }
 0x344   : > { %1037 = vadd.xlane.f32.xlu0 %v1036_v10 }
 0x3b1   : > { %v1004_v11 = vpop.xlane.xlu1 %1003 }
 0x3b2   : > { %v1005_v8 = vmax.f32 %v1004_v11, 1e-30 }
 0x3b4   : > { %1457 = vlog2.f32 %v1005_v8 }
 0x3be   : > { %v1458_v13 = vpop.eup %1457 }
 0x3bf   : > { %v1007_v14 = vmul.f32 0.6931472, %v1458_v13 }
 0x3c1   : > { %v1008_v15 = vadd.f32 %v1007_v14, %v985_v50 }
 0x3c3   : > { %v1019_v21 = vsub.f32 %v1008_v15, %v995_v16 }
 0x3c5   : > { %v1021_v22 = vsel %vm1020_vm15, %v1019_v21, 0.0 }
 0x3c6   : > { %1022 = vadd.xlane.f32.xlu1 %v1021_v22 }
 0x3d1   : > { %v1038_v12 = vpop.xlane.xlu0 %1037 }
 0x3d2   : > { %v1039_v7 = vrot.slane %v1038_v12, 4 }
 0x3d4   : > { %v1040_v23 = vadd.f32 %v1039_v7, %v1038_v12 }
 0x3d6   : > { %v1041_v24 = vrot.slane %v1040_v23, 2 }
 0x3d8   : > { %v1042_v30 = vadd.f32 %v1041_v24, %v1040_v23 }
 0x3da   : > { %v1043_v28 = vrot.slane %v1042_v30, 1 }
 0x3dc   : > { %v1044_v35 = vadd.f32 %v1043_v28, %v1042_v30 }
 0x453   : > { %v1023_v25 = vpop.xlane.xlu1 %1022 }
 0x454   : > { %v1024_v26 = vrot.slane %v1023_v25, 4 }
 0x456   : > { %v1025_v29 = vadd.f32 %v1024_v26, %v1023_v25 }
 0x458   : > { %v1026_v9 = vrot.slane %v1025_v29, 2 }
 0x45a   : > { %v1027_v18 = vadd.f32 %v1026_v9, %v1025_v29 }
 0x45c   : > { %v1028_v31 = vrot.slane %v1027_v18, 1 }
 0x45e   : > { %v1029_v32 = vadd.f32 %v1028_v31, %v1027_v18 }
 0x460   : > { %1349 = vpush %v1029_v32 }
 0x461   : > { %1351 = vpush %v1044_v35 }
 0x491   : > { %s1350_s13 = spop %1349 }
 0x492   : > { %s1033_s18 = smul.f32 0.5, %s1350_s13  ;;  %s1352_s15 = spop %1351 }
 0x493   : > { %s1048_s19 = smul.f32 0.5, %s1352_s15 }
 0x495   : > { %s1049_s11 = sadd.f32 %s1048_s19, %s1033_s18 }
 0x497   : > { %s1050_s29 = smul.f32 0.5, %s1049_s11 }
 0x499   : > { %v1060_v34 = vstv %s1050_s29 }
 0x49a   : > { %v1061_v43 = vsel %vm1059_vm3, %v1060_v34, 0.0 }
 0x49b   : > { %v1062_v44 = vadd.f32 %v1061_v43, %v1058_v17 }
 0x49d   : > { %v1063_v2 = vadd.f32 %v1062_v44, %v1051_v42 }
 0x49f   : > { %1064 = vst [vmem:[%s1831_s22] sm:$0x1] %v1063_v2 }
 0x4a0 PF: > { %p1065_p1 = scmp.eq.s32.totalorder %s1535_s26, 1 }
 0x4a1   : > { %v1107_v41 = vld [vmem:[%s1944_s7 + $0x8] sm:$0xff] (%p1065_p1)  ;;  %vm1108_vm4 = vcmask (%p1065_p1), 31744   ;;  %v1106_v45 = vld [vmem:[%s1944_s7] sm:$0xff] (%p1065_p1)  ;;  %s1963_s1 = sld [smem:[#allocation8_spill]] (%p1065_p1)  ;;  %vm1095_vm6 = vcmask (%p1065_p1), 253952   ;;  %v1549_v6 = vmov (%p1065_p1), 0.0  }
 0x4a2   : > { %1069 = sbr.rel (!%p1065_p1) target bundleno = 1565 (0x61d), region = 84  ;;  %v1112_v46 = vsel (%p1065_p1), %vm1108_vm4, %v1107_v41, -inf  ;;  %v1109_v48 = vsel (%p1065_p1), %vm1108_vm4, %v1106_v45, -inf  ;;  %v1136_v22 = vld [vmem:[%s1945_s8] sm:$0x3] (%p1065_p1)  ;;  %vm1148_vm9 = vcmask (%p1065_p1), 1041409  }
 0x4a3   : > { %1113 = vmax.xlane.f32.xlu0 (%p1065_p1), %v1112_v46  ;;  %v1138_v25 = vrot.slane (%p1065_p1), %v1136_v22, 1  ;;  %vm1163_vm10 = vcmp.eq.s32.totalorder (%p1065_p1), %v1771_v53, 1  ;;  %vm1166_vm11 = vcmp.eq.s32.totalorder (%p1065_p1), %v1771_v53, 2 }
 0x4a7   : > { %v1072_v33 = vld [vmem:[%s1963_s1] sm:$0x1] (%p1065_p1)  ;;  %1110 = vmax.xlane.f32.xlu0 (%p1065_p1), %v1109_v48 }
 0x4a8   : > { %v1073_v47 = vand.u32 (%p1065_p1), 2147483647, %v1072_v33  ;;  %v1077_v52 = vmax.f32 (%p1065_p1), %v1072_v33, 0.0  ;;  %vm1083_vm5 = vcmp.ge.f32.partialorder (%p1065_p1), %v1072_v33, 0.0 }
 0x4aa   : > { %v1074_v40 = vsub.f32 0.0, %v1073_v47 }
 0x4ac   : > { %v1075_v49 = vmul.f32 1.442695, %v1074_v40 }
 0x4ae   : > { %1459 = vpow2.f32 %v1075_v49 }
 0x4b8   : > { %v1460_v50 = vpop.eup %1459 }
 0x4b9   : > { %v1078_v51 = vadd.f32 1.0, %v1460_v50 }
 0x4bb   : > { %1461 = vlog2.f32 %v1078_v51 }
 0x4bc   : > { %1463 = vrcp.f32 %v1078_v51  ;;  %v1162_v51 = vld [vmem:[%s1831_s22] sm:$0x1] }
 0x4c5   : > { %v1462_v54 = vpop.eup %1461 }
 0x4c6   : > { %v1464_v55 = vpop.eup %1463  ;;  %v1080_v39 = vmul.f32 0.6931472, %v1462_v54 }
 0x4c7   : > { %v1084_v56 = vmul.f32 %v1464_v55, %v1460_v50 }
 0x4c8   : > { %v1081_v57 = vadd.f32 %v1080_v39, %v1077_v52 }
 0x4c9   : > { %v1085_v58 = vsel %vm1083_vm5, %v1464_v55, %v1084_v56 }
 0x4ca   : > { %v1086_v59 = vsub.f32 1.0, %v1085_v58  ;;  %v1088_v4 = vsub.f32 %v1081_v57, %v1072_v33  ;;  %v1090_v60 = vmul.f32 %v1085_v58, %v1085_v58 }
 0x4cc   : > { %v1087_v61 = vmul.f32 %v1086_v59, %v1086_v59  ;;  %v1091_v63 = vmul.f32 %v1090_v60, %v1081_v57 }
 0x4ce   : > { %v1089_v0 = vmul.f32 %v1088_v4, %v1087_v61  ;;  %v1093_v1 = vmul.f32 0.75, %v1091_v63 }
 0x4d0   : > { %v1092_v19 = vmul.f32 0.25, %v1089_v0 }
 0x4d2   : > { %v1094_v3 = vsub.f32 %v1092_v19, %v1093_v1 }
 0x4d4   : > { %v1096_v20 = vsel %vm1095_vm6, %v1094_v3, 0.0 }
 0x4d5   : > { %1097 = vadd.xlane.f32.xlu1 %v1096_v20 }
 0x530   : > { %v1114_v5 = vpop.xlane.xlu0 %1113 }
 0x531   : > { %vm1116_vm7 = vcmp.ge.f32.partialorder %v1107_v41, %v1114_v5 }
 0x532   : > { %v1322_v62 = vsel %vm1116_vm7, 1.0, %v1549_v6 }
 0x533   : > { %v1129_v10 = vsel %vm672_vm2, %v1322_v62, 0.0 }
 0x534   : > { %v1130_v11 = vrot.slane %v1129_v10, 4  ;;  %v1111_v8 = vpop.xlane.xlu0 %1110 }
 0x535   : > { %vm1115_vm8 = vcmp.ge.f32.partialorder %v1106_v45, %v1111_v8 }
 0x536   : > { %v1131_v13 = vadd.f32 %v1130_v11, %v1129_v10  ;;  %v1321_v14 = vsel %vm1115_vm8, 1.0, %v1549_v6 }
 0x537   : > { %v1122_v15 = vsel %vm672_vm2, %v1321_v14, 0.0  ;;  %vm1151_vm2 = vcmask 1024  }
 0x538   : > { %v1132_v16 = vrot.slane %v1131_v13, 2  ;;  %v1123_v21 = vrot.slane %v1122_v15, 4 }
 0x53a   : > { %v1133_v12 = vadd.f32 %v1132_v16, %v1131_v13  ;;  %v1124_v7 = vadd.f32 %v1123_v21, %v1122_v15 }
 0x53c   : > { %v1134_v23 = vrot.slane %v1133_v12, 1  ;;  %v1125_v24 = vrot.slane %v1124_v7, 2 }
 0x53e   : > { %v1135_v26 = vadd.f32 %v1134_v23, %v1133_v12  ;;  %v1126_v29 = vadd.f32 %v1125_v24, %v1124_v7 }
 0x540   : > { %v1127_v30 = vrot.slane %v1126_v29, 1  ;;  %v1142_v9 = vsub.f32 %v1135_v26, %v1138_v25 }
 0x542   : > { %v1128_v18 = vadd.f32 %v1127_v30, %v1126_v29  ;;  %v1144_v28 = vand.u32 2147483647, %v1142_v9 }
 0x544   : > { %v1141_v31 = vsub.f32 %v1128_v18, %v1136_v22  ;;  %v1147_v35 = vrot.slane %v1144_v28, 7 }
 0x546   : > { %v1143_v32 = vand.u32 2147483647, %v1141_v31 }
 0x548   : > { %v1149_v36 = vsel %vm1148_vm9, %v1147_v35, %v1143_v32 }
 0x549   : > { %v1152_v37 = vsel %vm1151_vm2, %v1149_v36, 0.0 }
 0x54a   : > { %1153 = vadd.xlane.f32.xlu1 %v1152_v37 }
 0x562   : > { %v1098_v27 = vpop.xlane.xlu1 %1097 }
 0x563   : > { %v1099_v38 = vrot.slane %v1098_v27, 4 }
 0x565   : > { %v1100_v17 = vadd.f32 %v1099_v38, %v1098_v27 }
 0x567   : > { %v1101_v34 = vrot.slane %v1100_v17, 2 }
 0x569   : > { %v1102_v42 = vadd.f32 %v1101_v34, %v1100_v17 }
 0x56b   : > { %v1103_v43 = vrot.slane %v1102_v42, 1 }
 0x56d   : > { %v1104_v44 = vadd.f32 %v1103_v43, %v1102_v42 }
 0x56f   : > { %1353 = vpush %v1104_v44 }
 0x5a0   : > { %s1354_s20 = spop %1353 }
 0x5a1   : > { %v1164_v40 = vstv %s1354_s20 }
 0x5a2   : > { %v1165_v50 = vsel %vm1163_vm10, %v1164_v40, 0.0 }
 0x5d7   : > { %v1154_v2 = vpop.xlane.xlu1 %1153 }
 0x5d8   : > { %v1155_v41 = vrot.slane %v1154_v2, 4 }
 0x5da   : > { %v1156_v45 = vadd.f32 %v1155_v41, %v1154_v2 }
 0x5dc   : > { %v1157_v33 = vrot.slane %v1156_v45, 2 }
 0x5de   : > { %v1158_v46 = vadd.f32 %v1157_v33, %v1156_v45 }
 0x5e0   : > { %v1159_v47 = vrot.slane %v1158_v46, 1 }
 0x5e2   : > { %v1160_v48 = vadd.f32 %v1159_v47, %v1158_v46 }
 0x5e4   : > { %1355 = vpush %v1160_v48 }
 0x615   : > { %s1356_s21 = spop %1355 }
 0x616   : > { %v1167_v49 = vstv %s1356_s21 }
 0x617   : > { %v1168_v52 = vsel %vm1166_vm11, %v1167_v49, 0.0 }
 0x618   : > { %v1169_v54 = vadd.f32 %v1168_v52, %v1165_v50 }
 0x61a   : > { %v1170_v55 = vadd.f32 %v1169_v54, %v1162_v51 }
 0x61c   : > { %1171 = vst [vmem:[%s1831_s22] sm:$0x1] %v1170_v55 }
 0x61d PF: > { %s1964_s13 = sshll.u32 %s1535_s26, 4  ;;  %s1185_s11 = sshll.u32 %s1831_s22, 4  ;;  %s1186_s11 = int_to_ptr.vmem [resolvable:$true] %s1185_s11 }
 0x61e   : > { %s1893_s19 = scalar_lea.hbm %s1949_s12, %s1964_s13  ;;  %s1965_s29 = sand.u32 1, %s1527_s24  }
 0x61f   : > { %s1173_s20 = scalar_lea.sflag [#allocation5], %s1965_s29  ;;  %s1465_s21 = scalar_lea.vmem %s1186_s11, 16 }
 0x620   : > { %p1466_p2 = scmp.ne.s32.totalorder %s1186_s11, %s1465_s21  ;;  %s1550_s0 = smov [#allocation4]  }
 0x621   : > { %s1469_s1 = sshll.u32 %s1550_s0, 4  ;;  %s1470_s1 = int_to_ptr.vmem [resolvable:$false] %s1469_s1 }
 0x622   : > { %p1467_p3 = pnand %p1466_p2, %p1659_p4  ;;  %s1471_s26 = scalar_lea.vmem %s1470_s1, 32 }
 0x623   : > { %p1472_p6 = scmp.lt.s32.totalorder %s1186_s11, %s1470_s1  ;;  %p1473_p7 = scmp.lt.s32.totalorder %s1471_s26, %s1465_s21 }
 0x624   : > { %p1468_p5 = pneg %p1467_p3 }
 0x625   : > { %p1474_p9 = por %p1473_p7, %p1472_p6 }
 0x627   : > { %p1475_p10 = pnand %p1474_p9, %p1468_p5 }
 0x629   : > { %1478 = shalt.err (!%p1475_p10)
}
 0x62a   : > { %s1479_s22 = scalar_lea.hbm %s1893_s19, 16  ;;  %s1483_s0 = scalar_lea.hbm %s1949_s12, 32 }
 0x62b   : > { %p1480_p11 = scmp.ne.s32.totalorder %s1893_s19, %s1479_s22  ;;  %p1484_p0 = scmp.lt.u32.totalorder %s1893_s19, %s1949_s12 }
 0x62c   : > { %p1485_p1 = scmp.lt.u32.totalorder %s1483_s0, %s1479_s22  ;;  %p1487_p3 = scmp.lt.u32.totalorder %s1479_s22, %s1893_s19 }
 0x62d   : > { %p1481_p12 = pnand %p1480_p11, %p1659_p4 }
 0x62e   : > { %p1486_p2 = por %p1485_p1, %p1484_p0 }
 0x62f   : > { %p1482_p13 = pneg %p1481_p12 }
 0x630   : > { %p1488_p5 = por %p1487_p3, %p1486_p2 }
 0x632   : > { %p1489_p6 = pnand %p1488_p5, %p1482_p13 }
 0x634   : > { %1492 = shalt.err (!%p1489_p6)
}
 0x635   : > { %1357 = dma.vmem_to_hbm [thread:$0]  (%p1659_p4), %s1186_s11, 16, %s1893_s19, %s1173_s20  }
 0x636 PF: > { %p1363_p7 = scmp.ge.s32.totalorder %s1543_s28, 2  ;;  %s1197_s29 = sand.u32 1, %s1523_s23  }
 0x637   : > { %s1198_s21 = scalar_lea.sflag [#allocation5], %s1197_s29 }
 0x638   : > { %p1360_p9 = pnand %p1363_p7, %p1666_p8 }
 0x63a   : > { %1518 = dma.done.wait (!%p1360_p9), %s1198_s21, 16  }
 0x63b   : > { %1520 = vsyncadd (!%p1360_p9), %s1198_s21, 4294967280  ;;  %s26_s28 = sadd.s32 1, %s1543_s28   ;;  %s1966_s23 = smov %s1527_s24 }
 0x63c   : > { %p23_p10 = scmp.ge.s32.totalorder %s26_s28, 4   ;;  %s1967_s24 = smov %s1531_s25 }
 0x63d   : > { %s1968_s25 = smov %s1672_s17  ;;  %s1969_s26 = smov %s1539_s27 }
 0x63e   : > { %s1970_s27 = smov %s1972_s30  ;;  %25 = sbr.rel (!%p23_p10) target bundleno = 8 (0x8), region = 131 }
 0x645   :  { %1202 = vsyncpa [#allocation5], 1 }
 0x646   :  { %1204 = vsyncpa [#allocation5 + $0x1], 1 }

</bundles_post_ra>
